<compile_context>
chip_gen: v5e
topology: v5e:2x2
jax: 0.10.0
libtpu: 0.0.40
codegen_flags: <defaults>
</compile_context>

<pallas_src>
import functools

import numpy as np
import jax
import jax.numpy as jnp
from jax import lax
from jax.experimental import pallas as pl
from jax.experimental.pallas import tpu as pltpu


# ----------------------------------------------------------------------------
# Fused kernel: Phi + K-step VI + 3x3 gather + value_cache + MLP head.
# One grid step handles TB maps packed along the lane axis: planes are (H, TB*W).
# ----------------------------------------------------------------------------
def _fused_vin_kernel(obs_ref, wphi_ref, bphi_ref, ssel_ref,
                      w1_ref, b1_ref, w2_ref, b2_ref, wl_ref, bl_ref,
                      logits_ref, vcache_ref, *, H, W, TB, K):
    L = TB * W

    wall = obs_ref[0]      # (H, L)
    agent = obs_ref[1]
    goal = obs_ref[2]
    sel = obs_ref[3]       # one-hot agent-position selector (built in the wrapper)

    # ---- edge masks, built once (shared by VI shifts and the 3x3 gather) ----
    row = lax.broadcasted_iota(jnp.int32, (H, L), 0)
    col = lax.broadcasted_iota(jnp.int32, (H, L), 1)
    if (W & (W - 1)) == 0:
        col_in_map = jnp.bitwise_and(col, W - 1)
    else:
        col_in_map = col % W

    def edge_mask(dr, dc):
        # positions (i, j) whose neighbor (i+dr, j_in_map+dc) is inside the map
        m = None
        if dr > 0:
            m = row < (H - dr)
        elif dr < 0:
            m = row >= (-dr)
        if dc > 0:
            cm = col_in_map < (W - dc)
            m = cm if m is None else (m & cm)
        elif dc < 0:
            cm = col_in_map >= (-dc)
            m = cm if m is None else (m & cm)
        return m

    def rolled(x, dr, dc):
        # y[i, j] = x[(i + dr) % H, (j + dc) % L]  (pure XLU rotates; no masking)
        if dr != 0:
            x = pltpu.roll(x, shift=(-dr) % H, axis=0)
        if dc != 0:
            x = pltpu.roll(x, shift=(-dc) % L, axis=1)
        return x

    def shifted(x, dr, dc):
        # y[i, j] = x[i+dr, j+dc] if that position is inside the same map, else 0
        y = rolled(x, dr, dc)
        m = edge_mask(dr, dc)
        return y if m is None else jnp.where(m, y, 0.0)

    # ---- Phi: 3->3 linear + ReLU (scalar SMEM weights, broadcasts hoisted) ----
    def phi_channel(c):
        z = (wall * wphi_ref[3 * c + 0]
             + agent * wphi_ref[3 * c + 1]
             + goal * wphi_ref[3 * c + 2]
             + bphi_ref[c])
        return jnp.maximum(z, 0.0)

    p = phi_channel(0)      # phi[..., 0]
    rin = phi_channel(1)    # phi[..., 1]
    rout = phi_channel(2)   # phi[..., 2]

    # ---- K-step value iteration; state carried in vregs (no VMEM round-trip) ----
    # candidate_d = p * shift_d(v) + shift_d(rin) - rout ; fold the masks into p
    # and the rin/rout terms once, so the hot loop is roll + mul + add + max.
    dirs = ((1, 0), (-1, 0), (0, 1), (0, -1))
    p_dir, rc_dir = [], []
    for dr, dc in dirs:
        p_dir.append(jnp.where(edge_mask(dr, dc), p, 0.0))
        rc_dir.append(shifted(rin, dr, dc) - rout)

    v = jnp.zeros((H, L), jnp.float32)
    for tt in range(K):
        c0 = p_dir[0] * rolled(v, 1, 0) + rc_dir[0]     # neighbor below
        c1 = p_dir[1] * rolled(v, -1, 0) + rc_dir[1]    # neighbor above
        c2 = p_dir[2] * rolled(v, 0, 1) + rc_dir[2]     # neighbor right
        c3 = p_dir[3] * rolled(v, 0, -1) + rc_dir[3]    # neighbor left
        vnew = jnp.maximum(jnp.maximum(c0, c1), jnp.maximum(c2, c3))
        v = vnew if tt == 0 else jnp.maximum(vnew, v)   # VP_batch: v joins max after step 0

    # ---- 3x3 neighborhood gather via shifted one-hot selectors (no dyn. indexing) ----
    # window value X[r+dr, c+dc] == sum over the map of shifted(sel, -dr, -dc) * X
    # (zero outside the map).  Wall windows pad with 1 -> use 1 - (free window).
    offsets = tuple((dr, dc) for dr in (-1, 0, 1) for dc in (-1, 0, 1))
    sel_sh = [shifted(sel, -dr, -dc) for dr, dc in offsets]   # 9 shifted selectors
    free = 1.0 - wall

    def window_rows(x):
        return [jnp.sum(s * x, axis=0, keepdims=True) for s in sel_sh]   # 9 x (1, L)

    p_rows = window_rows(free) + window_rows(agent) + window_rows(goal) + window_rows(v)
    P = jnp.concatenate(p_rows, axis=0)                                  # (36, L)

    # per-map (lane-group) reduction with one small MXU matmul
    g = jnp.dot(P, ssel_ref[...], preferred_element_type=jnp.float32)   # (36, TB)
    flat = jnp.concatenate([1.0 - g[0:9, :], g[9:36, :]], axis=0)        # (36, TB) = flat_in^T

    # ---- hidden layers + logits head, feature-major so batch stays on lanes ----
    h = jnp.dot(w1_ref[...], flat, preferred_element_type=jnp.float32) + b1_ref[...]
    h = jnp.dot(w2_ref[...], h, preferred_element_type=jnp.float32) + b2_ref[...]
    logits = jnp.dot(wl_ref[...], h, preferred_element_type=jnp.float32) + bl_ref[...]

    logits_ref[0] = logits              # (n_out, TB)
    vcache_ref[0] = g[31:32, :]         # v-window center (offset (0,0)) == v[agent_pos]


def _call_fused_kernel(packed_obs, w_phi_flat, b_phi, ssel,
                       w1, b1c, w2, b2c, wl, blc, *, H, W, TB, K, NB):
    L = TB * W
    n_out = wl.shape[0]
    kernel = functools.partial(_fused_vin_kernel, H=H, W=W, TB=TB, K=K)
    grid_spec = pltpu.PrefetchScalarGridSpec(
        num_scalar_prefetch=0,
        grid=(NB,),
        in_specs=[
            pl.BlockSpec((4, H, L), lambda b: (0, 0, b)),          # packed wall/agent/goal/sel
            pl.BlockSpec(memory_space=pltpu.MemorySpace.SMEM),     # Phi weight, flat (9,)
            pl.BlockSpec(memory_space=pltpu.MemorySpace.SMEM),     # Phi bias (3,)
            pl.BlockSpec((L, TB), lambda b: (0, 0)),               # lane-group selector
            pl.BlockSpec(w1.shape, lambda b: (0, 0)),              # (32, 36)
            pl.BlockSpec(b1c.shape, lambda b: (0, 0)),             # (32, 1)
            pl.BlockSpec(w2.shape, lambda b: (0, 0)),              # (32, 32)
            pl.BlockSpec(b2c.shape, lambda b: (0, 0)),             # (32, 1)
            pl.BlockSpec(wl.shape, lambda b: (0, 0)),              # (5, 32)
            pl.BlockSpec(blc.shape, lambda b: (0, 0)),             # (5, 1)
        ],
        out_specs=(
            pl.BlockSpec((1, n_out, TB), lambda b: (b, 0, 0)),
            pl.BlockSpec((1, 1, TB), lambda b: (b, 0, 0)),
        ),
    )
    return pl.pallas_call(
        kernel,
        out_shape=(jax.ShapeDtypeStruct((NB, n_out, TB), jnp.float32),
                   jax.ShapeDtypeStruct((NB, 1, TB), jnp.float32)),
        grid_spec=grid_spec,
        compiler_params=pltpu.CompilerParams(dimension_semantics=("parallel",)),
    )(packed_obs, w_phi_flat, b_phi, ssel, w1, b1c, w2, b2c, wl, blc)


# ----------------------------------------------------------------------------
# Wrapper: lane-packing layout, agent-position one-hot, unpack of the outputs.
# ----------------------------------------------------------------------------
@functools.partial(jax.jit, static_argnames=("K",))
def vin_forward(obs, params, K=10):
    """obs: (B, H, W, 3) float32, channels [wall, agent, goal] -> (logits, value_cache)."""
    B, H, W, _ = obs.shape
    n_out = params["wl"].shape[0]

    # pack TB maps per grid step along the lane axis so TB*W is a multiple of 128
    TB = int(np.lcm(W, 128) // W)
    B_pad = ((B + TB - 1) // TB) * TB
    NB = B_pad // TB

    obs_p = jnp.pad(obs, ((0, B_pad - B), (0, 0), (0, 0), (0, 0)))
    wall, agent, goal = obs_p[..., 0], obs_p[..., 1], obs_p[..., 2]

    # agent-position selector: one-hot at the first nonzero agent cell
    # ((0,0) for an all-zero observation), matching torch nonzero()[0] / fallback.
    a_flat = jnp.argmax(agent.reshape(B_pad, H * W), axis=-1)
    sel = jax.nn.one_hot(a_flat, H * W, dtype=jnp.float32).reshape(B_pad, H, W)

    packed = jnp.stack([wall, agent, goal, sel], axis=0)             # (4, B_pad, H, W)
    packed = packed.transpose(0, 2, 1, 3).reshape(4, H, B_pad * W)   # lane-packed

    # per-map lane-group reduction matrix: ssel[j, m] = 1 iff j // W == m
    ssel = jnp.repeat(jnp.eye(TB, dtype=jnp.float32), W, axis=0)     # (TB*W, TB)

    logits_blk, vcache_blk = _call_fused_kernel(
        packed, params["w_phi"].reshape(9), params["b_phi"], ssel,
        params["w1"], params["b1"][:, None],
        params["w2"], params["b2"][:, None],
        params["wl"], params["bl"][:, None],
        H=H, W=W, TB=TB, K=K, NB=NB)

    logits = logits_blk.transpose(0, 2, 1).reshape(B_pad, n_out)[:B]
    value_cache = vcache_blk.transpose(0, 2, 1).reshape(B_pad, 1)[:B]
    return logits, value_cache


# ----------------------------------------------------------------------------
# Parameter setup (torch-layout weights: (out, in); biases (out,)).
# ----------------------------------------------------------------------------
def _normc_init(key, shape, std=1.0):
    w = jax.random.normal(key, shape, jnp.float32)
    return w * std / jnp.sqrt(jnp.sum(w * w, axis=1, keepdims=True))


def init_params(key, hiddens=(32, 32), num_outputs=5):
    ks = jax.random.split(key, 5)
    h1, h2 = hiddens
    # TODO(synk): _value_branch (32->1) and `speaker` exist in __init__ but are
    # unused by forward(); omitted.
    return dict(
        w_phi=0.5 * jax.random.normal(ks[0], (3, 3), jnp.float32),   # SlimFC(3,3) (out,in)
        b_phi=0.1 * jax.random.normal(ks[1], (3,), jnp.float32),
        w1=_normc_init(ks[2], (h1, 36), 1.0), b1=jnp.zeros((h1,), jnp.float32),
        w2=_normc_init(ks[3], (h2, h1), 1.0), b2=jnp.zeros((h2,), jnp.float32),
        wl=_normc_init(ks[4], (num_outputs, h2), 0.01),
        bl=jnp.zeros((num_outputs,), jnp.float32),
    )


if __name__ == "__main__":
    key = jax.random.PRNGKey(0)
    B, H, W = 18, 8, 8
    k_wall, k_agent, k_goal, k_params = jax.random.split(key, 4)

    # deterministic small gridworld observations
    wall = (jax.random.uniform(k_wall, (B, H, W)) < 0.2).astype(jnp.float32)
    a_pos = jax.random.randint(k_agent, (B,), 0, H * W)
    g_pos = jax.random.randint(k_goal, (B,), 0, H * W)
    agent = jax.nn.one_hot(a_pos, H * W, dtype=jnp.float32).reshape(B, H, W)
    goal = jax.nn.one_hot(g_pos, H * W, dtype=jnp.float32).reshape(B, H, W)
    wall = wall * (1.0 - agent) * (1.0 - goal)
    obs = jnp.stack([wall, agent, goal], axis=-1)    # (B, H, W, 3)

    params = init_params(k_params, hiddens=(32, 32), num_outputs=5)

    logits, value = vin_forward(obs, params, K=10)
    jax.block_until_ready((logits, value))
    assert logits.shape == (B, 5) and value.shape == (B, 1)
    assert bool(jnp.all(jnp.isfinite(logits))) and bool(jnp.all(jnp.isfinite(value)))
    print("KERNEL_OK")
</pallas_src>

<mosaic_0001>
module attributes {stable_mosaic.version = 11 : i64} {
  func.func @_fused_vin_kernel(%arg0: i32, %arg1: memref<4x8x128xf32, #tpu.memory_space<vmem>>, %arg2: memref<9xf32, #tpu.memory_space<smem>>, %arg3: memref<3xf32, #tpu.memory_space<smem>>, %arg4: memref<128x16xf32, #tpu.memory_space<vmem>>, %arg5: memref<32x36xf32, #tpu.memory_space<vmem>>, %arg6: memref<32x1xf32, #tpu.memory_space<vmem>>, %arg7: memref<32x32xf32, #tpu.memory_space<vmem>>, %arg8: memref<32x1xf32, #tpu.memory_space<vmem>>, %arg9: memref<5x32xf32, #tpu.memory_space<vmem>>, %arg10: memref<5x1xf32, #tpu.memory_space<vmem>>, %arg11: memref<1x5x16xf32, #tpu.memory_space<vmem>>, %arg12: memref<1x1x16xf32, #tpu.memory_space<vmem>>) attributes {dimension_semantics = [#tpu.dimension_semantics<parallel>], iteration_bounds = array<i64: 2>, scalar_prefetch = 0 : i64, scratch_operands = 0 : i64, tpu.core_type = #tpu.core_type<tc>, window_params = [{transform_indices = @transform_0, window_bounds = array<i64: 4, 8, 128>}, {transform_indices = @transform_1, window_bounds = array<i64: 9>}, {transform_indices = @transform_2, window_bounds = array<i64: 3>}, {pipeline_mode = #tpu.pipeline_mode<synchronous>, transform_indices = @transform_3, window_bounds = array<i64: 128, 16>}, {pipeline_mode = #tpu.pipeline_mode<synchronous>, transform_indices = @transform_4, window_bounds = array<i64: 32, 36>}, {pipeline_mode = #tpu.pipeline_mode<synchronous>, transform_indices = @transform_5, window_bounds = array<i64: 32, 1>}, {pipeline_mode = #tpu.pipeline_mode<synchronous>, transform_indices = @transform_6, window_bounds = array<i64: 32, 32>}, {pipeline_mode = #tpu.pipeline_mode<synchronous>, transform_indices = @transform_7, window_bounds = array<i64: 32, 1>}, {pipeline_mode = #tpu.pipeline_mode<synchronous>, transform_indices = @transform_8, window_bounds = array<i64: 5, 32>}, {pipeline_mode = #tpu.pipeline_mode<synchronous>, transform_indices = @transform_9, window_bounds = array<i64: 5, 1>}, {transform_indices = @transform_10, window_bounds = array<i64: 1, 5, 16>}, {transform_indices = @transform_11, window_bounds = array<i64: 1, 1, 16>}]} {
    %c0 = arith.constant 0 : index
    %c0_0 = arith.constant 0 : index
    %c0_1 = arith.constant 0 : index
    %0 = vector.load %arg1[%c0, %c0_0, %c0_1] : memref<4x8x128xf32, #tpu.memory_space<vmem>>, vector<1x8x128xf32>
    %1 = vector.shape_cast %0 : vector<1x8x128xf32> to vector<8x128xf32>
    %c1 = arith.constant 1 : index
    %c0_2 = arith.constant 0 : index
    %c0_3 = arith.constant 0 : index
    %2 = vector.load %arg1[%c1, %c0_2, %c0_3] : memref<4x8x128xf32, #tpu.memory_space<vmem>>, vector<1x8x128xf32>
    %3 = vector.shape_cast %2 : vector<1x8x128xf32> to vector<8x128xf32>
    %c2 = arith.constant 2 : index
    %c0_4 = arith.constant 0 : index
    %c0_5 = arith.constant 0 : index
    %4 = vector.load %arg1[%c2, %c0_4, %c0_5] : memref<4x8x128xf32, #tpu.memory_space<vmem>>, vector<1x8x128xf32>
    %5 = vector.shape_cast %4 : vector<1x8x128xf32> to vector<8x128xf32>
    %c3 = arith.constant 3 : index
    %c0_6 = arith.constant 0 : index
    %c0_7 = arith.constant 0 : index
    %6 = vector.load %arg1[%c3, %c0_6, %c0_7] : memref<4x8x128xf32, #tpu.memory_space<vmem>>, vector<1x8x128xf32>
    %7 = vector.shape_cast %6 : vector<1x8x128xf32> to vector<8x128xf32>
    %8 = tpu.iota {dimensions = array<i32: 0>} : vector<8x128xi32>
    %9 = tpu.iota {dimensions = array<i32: 1>} : vector<8x128xi32>
    %c7_i32 = arith.constant 7 : i32
    %10 = vector.broadcast %c7_i32 : i32 to vector<8x128xi32>
    %11 = arith.andi %9, %10 : vector<8x128xi32>
    %c0_8 = arith.constant 0 : index
    %12 = memref.load %arg2[%c0_8] : memref<9xf32, #tpu.memory_space<smem>>
    %13 = vector.broadcast %12 : f32 to vector<8x128xf32>
    %14 = arith.mulf %1, %13 : vector<8x128xf32>
    %c1_9 = arith.constant 1 : index
    %15 = memref.load %arg2[%c1_9] : memref<9xf32, #tpu.memory_space<smem>>
    %16 = vector.broadcast %15 : f32 to vector<8x128xf32>
    %17 = arith.mulf %3, %16 : vector<8x128xf32>
    %18 = arith.addf %14, %17 : vector<8x128xf32>
    %c2_10 = arith.constant 2 : index
    %19 = memref.load %arg2[%c2_10] : memref<9xf32, #tpu.memory_space<smem>>
    %20 = vector.broadcast %19 : f32 to vector<8x128xf32>
    %21 = arith.mulf %5, %20 : vector<8x128xf32>
    %22 = arith.addf %18, %21 : vector<8x128xf32>
    %c0_11 = arith.constant 0 : index
    %23 = memref.load %arg3[%c0_11] : memref<3xf32, #tpu.memory_space<smem>>
    %24 = vector.broadcast %23 : f32 to vector<8x128xf32>
    %25 = arith.addf %22, %24 : vector<8x128xf32>
    %cst = arith.constant 0.000000e+00 : f32
    %26 = vector.broadcast %cst : f32 to vector<8x128xf32>
    %27 = arith.maximumf %25, %26 : vector<8x128xf32>
    %c3_12 = arith.constant 3 : index
    %28 = memref.load %arg2[%c3_12] : memref<9xf32, #tpu.memory_space<smem>>
    %29 = vector.broadcast %28 : f32 to vector<8x128xf32>
    %30 = arith.mulf %1, %29 : vector<8x128xf32>
    %c4 = arith.constant 4 : index
    %31 = memref.load %arg2[%c4] : memref<9xf32, #tpu.memory_space<smem>>
    %32 = vector.broadcast %31 : f32 to vector<8x128xf32>
    %33 = arith.mulf %3, %32 : vector<8x128xf32>
    %34 = arith.addf %30, %33 : vector<8x128xf32>
    %c5 = arith.constant 5 : index
    %35 = memref.load %arg2[%c5] : memref<9xf32, #tpu.memory_space<smem>>
    %36 = vector.broadcast %35 : f32 to vector<8x128xf32>
    %37 = arith.mulf %5, %36 : vector<8x128xf32>
    %38 = arith.addf %34, %37 : vector<8x128xf32>
    %c1_13 = arith.constant 1 : index
    %39 = memref.load %arg3[%c1_13] : memref<3xf32, #tpu.memory_space<smem>>
    %40 = vector.broadcast %39 : f32 to vector<8x128xf32>
    %41 = arith.addf %38, %40 : vector<8x128xf32>
    %cst_14 = arith.constant 0.000000e+00 : f32
    %42 = vector.broadcast %cst_14 : f32 to vector<8x128xf32>
    %43 = arith.maximumf %41, %42 : vector<8x128xf32>
    %c6 = arith.constant 6 : index
    %44 = memref.load %arg2[%c6] : memref<9xf32, #tpu.memory_space<smem>>
    %45 = vector.broadcast %44 : f32 to vector<8x128xf32>
    %46 = arith.mulf %1, %45 : vector<8x128xf32>
    %c7 = arith.constant 7 : index
    %47 = memref.load %arg2[%c7] : memref<9xf32, #tpu.memory_space<smem>>
    %48 = vector.broadcast %47 : f32 to vector<8x128xf32>
    %49 = arith.mulf %3, %48 : vector<8x128xf32>
    %50 = arith.addf %46, %49 : vector<8x128xf32>
    %c8 = arith.constant 8 : index
    %51 = memref.load %arg2[%c8] : memref<9xf32, #tpu.memory_space<smem>>
    %52 = vector.broadcast %51 : f32 to vector<8x128xf32>
    %53 = arith.mulf %5, %52 : vector<8x128xf32>
    %54 = arith.addf %50, %53 : vector<8x128xf32>
    %c2_15 = arith.constant 2 : index
    %55 = memref.load %arg3[%c2_15] : memref<3xf32, #tpu.memory_space<smem>>
    %56 = vector.broadcast %55 : f32 to vector<8x128xf32>
    %57 = arith.addf %54, %56 : vector<8x128xf32>
    %cst_16 = arith.constant 0.000000e+00 : f32
    %58 = vector.broadcast %cst_16 : f32 to vector<8x128xf32>
    %59 = arith.maximumf %57, %58 : vector<8x128xf32>
    %c7_i32_17 = arith.constant 7 : i32
    %60 = vector.broadcast %c7_i32_17 : i32 to vector<8x128xi32>
    %61 = arith.cmpi slt, %8, %60 : vector<8x128xi32>
    %cst_18 = arith.constant 0.000000e+00 : f32
    %62 = vector.broadcast %cst_18 : f32 to vector<8x128xf32>
    %63 = arith.select %61, %27, %62 : vector<8x128xi1>, vector<8x128xf32>
    %c7_i32_19 = arith.constant 7 : i32
    %64 = tpu.dynamic_rotate %43 by %c7_i32_19 dim 0 : vector<8x128xf32>, i32 -> vector<8x128xf32>
    %c7_i32_20 = arith.constant 7 : i32
    %65 = vector.broadcast %c7_i32_20 : i32 to vector<8x128xi32>
    %66 = arith.cmpi slt, %8, %65 : vector<8x128xi32>
    %cst_21 = arith.constant 0.000000e+00 : f32
    %67 = vector.broadcast %cst_21 : f32 to vector<8x128xf32>
    %68 = arith.select %66, %64, %67 : vector<8x128xi1>, vector<8x128xf32>
    %69 = arith.subf %68, %59 : vector<8x128xf32>
    %c1_i32 = arith.constant 1 : i32
    %70 = vector.broadcast %c1_i32 : i32 to vector<8x128xi32>
    %71 = arith.cmpi sge, %8, %70 : vector<8x128xi32>
    %cst_22 = arith.constant 0.000000e+00 : f32
    %72 = vector.broadcast %cst_22 : f32 to vector<8x128xf32>
    %73 = arith.select %71, %27, %72 : vector<8x128xi1>, vector<8x128xf32>
    %c1_i32_23 = arith.constant 1 : i32
    %74 = tpu.dynamic_rotate %43 by %c1_i32_23 dim 0 : vector<8x128xf32>, i32 -> vector<8x128xf32>
    %c1_i32_24 = arith.constant 1 : i32
    %75 = vector.broadcast %c1_i32_24 : i32 to vector<8x128xi32>
    %76 = arith.cmpi sge, %8, %75 : vector<8x128xi32>
    %cst_25 = arith.constant 0.000000e+00 : f32
    %77 = vector.broadcast %cst_25 : f32 to vector<8x128xf32>
    %78 = arith.select %76, %74, %77 : vector<8x128xi1>, vector<8x128xf32>
    %79 = arith.subf %78, %59 : vector<8x128xf32>
    %c7_i32_26 = arith.constant 7 : i32
    %80 = vector.broadcast %c7_i32_26 : i32 to vector<8x128xi32>
    %81 = arith.cmpi slt, %11, %80 : vector<8x128xi32>
    %cst_27 = arith.constant 0.000000e+00 : f32
    %82 = vector.broadcast %cst_27 : f32 to vector<8x128xf32>
    %83 = arith.select %81, %27, %82 : vector<8x128xi1>, vector<8x128xf32>
    %c127_i32 = arith.constant 127 : i32
    %84 = tpu.dynamic_rotate %43 by %c127_i32 dim 1 : vector<8x128xf32>, i32 -> vector<8x128xf32>
    %c7_i32_28 = arith.constant 7 : i32
    %85 = vector.broadcast %c7_i32_28 : i32 to vector<8x128xi32>
    %86 = arith.cmpi slt, %11, %85 : vector<8x128xi32>
    %cst_29 = arith.constant 0.000000e+00 : f32
    %87 = vector.broadcast %cst_29 : f32 to vector<8x128xf32>
    %88 = arith.select %86, %84, %87 : vector<8x128xi1>, vector<8x128xf32>
    %89 = arith.subf %88, %59 : vector<8x128xf32>
    %c1_i32_30 = arith.constant 1 : i32
    %90 = vector.broadcast %c1_i32_30 : i32 to vector<8x128xi32>
    %91 = arith.cmpi sge, %11, %90 : vector<8x128xi32>
    %cst_31 = arith.constant 0.000000e+00 : f32
    %92 = vector.broadcast %cst_31 : f32 to vector<8x128xf32>
    %93 = arith.select %91, %27, %92 : vector<8x128xi1>, vector<8x128xf32>
    %c1_i32_32 = arith.constant 1 : i32
    %94 = tpu.dynamic_rotate %43 by %c1_i32_32 dim 1 : vector<8x128xf32>, i32 -> vector<8x128xf32>
    %c1_i32_33 = arith.constant 1 : i32
    %95 = vector.broadcast %c1_i32_33 : i32 to vector<8x128xi32>
    %96 = arith.cmpi sge, %11, %95 : vector<8x128xi32>
    %cst_34 = arith.constant 0.000000e+00 : f32
    %97 = vector.broadcast %cst_34 : f32 to vector<8x128xf32>
    %98 = arith.select %96, %94, %97 : vector<8x128xi1>, vector<8x128xf32>
    %99 = arith.subf %98, %59 : vector<8x128xf32>
    %cst_35 = arith.constant 0.000000e+00 : f32
    %100 = vector.broadcast %cst_35 : f32 to vector<8x128xf32>
    %c7_i32_36 = arith.constant 7 : i32
    %101 = tpu.dynamic_rotate %100 by %c7_i32_36 dim 0 : vector<8x128xf32>, i32 -> vector<8x128xf32>
    %102 = arith.mulf %63, %101 : vector<8x128xf32>
    %103 = arith.addf %102, %69 : vector<8x128xf32>
    %c1_i32_37 = arith.constant 1 : i32
    %104 = tpu.dynamic_rotate %100 by %c1_i32_37 dim 0 : vector<8x128xf32>, i32 -> vector<8x128xf32>
    %105 = arith.mulf %73, %104 : vector<8x128xf32>
    %106 = arith.addf %105, %79 : vector<8x128xf32>
    %c127_i32_38 = arith.constant 127 : i32
    %107 = tpu.dynamic_rotate %100 by %c127_i32_38 dim 1 : vector<8x128xf32>, i32 -> vector<8x128xf32>
    %108 = arith.mulf %83, %107 : vector<8x128xf32>
    %109 = arith.addf %108, %89 : vector<8x128xf32>
    %c1_i32_39 = arith.constant 1 : i32
    %110 = tpu.dynamic_rotate %100 by %c1_i32_39 dim 1 : vector<8x128xf32>, i32 -> vector<8x128xf32>
    %111 = arith.mulf %93, %110 : vector<8x128xf32>
    %112 = arith.addf %111, %99 : vector<8x128xf32>
    %113 = arith.maximumf %103, %106 : vector<8x128xf32>
    %114 = arith.maximumf %109, %112 : vector<8x128xf32>
    %115 = arith.maximumf %113, %114 : vector<8x128xf32>
    %c7_i32_40 = arith.constant 7 : i32
    %116 = tpu.dynamic_rotate %115 by %c7_i32_40 dim 0 : vector<8x128xf32>, i32 -> vector<8x128xf32>
    %117 = arith.mulf %63, %116 : vector<8x128xf32>
    %118 = arith.addf %117, %69 : vector<8x128xf32>
    %c1_i32_41 = arith.constant 1 : i32
    %119 = tpu.dynamic_rotate %115 by %c1_i32_41 dim 0 : vector<8x128xf32>, i32 -> vector<8x128xf32>
    %120 = arith.mulf %73, %119 : vector<8x128xf32>
    %121 = arith.addf %120, %79 : vector<8x128xf32>
    %c127_i32_42 = arith.constant 127 : i32
    %122 = tpu.dynamic_rotate %115 by %c127_i32_42 dim 1 : vector<8x128xf32>, i32 -> vector<8x128xf32>
    %123 = arith.mulf %83, %122 : vector<8x128xf32>
    %124 = arith.addf %123, %89 : vector<8x128xf32>
    %c1_i32_43 = arith.constant 1 : i32
    %125 = tpu.dynamic_rotate %115 by %c1_i32_43 dim 1 : vector<8x128xf32>, i32 -> vector<8x128xf32>
    %126 = arith.mulf %93, %125 : vector<8x128xf32>
    %127 = arith.addf %126, %99 : vector<8x128xf32>
    %128 = arith.maximumf %118, %121 : vector<8x128xf32>
    %129 = arith.maximumf %124, %127 : vector<8x128xf32>
    %130 = arith.maximumf %128, %129 : vector<8x128xf32>
    %131 = arith.maximumf %130, %115 : vector<8x128xf32>
    %c7_i32_44 = arith.constant 7 : i32
    %132 = tpu.dynamic_rotate %131 by %c7_i32_44 dim 0 : vector<8x128xf32>, i32 -> vector<8x128xf32>
    %133 = arith.mulf %63, %132 : vector<8x128xf32>
    %134 = arith.addf %133, %69 : vector<8x128xf32>
    %c1_i32_45 = arith.constant 1 : i32
    %135 = tpu.dynamic_rotate %131 by %c1_i32_45 dim 0 : vector<8x128xf32>, i32 -> vector<8x128xf32>
    %136 = arith.mulf %73, %135 : vector<8x128xf32>
    %137 = arith.addf %136, %79 : vector<8x128xf32>
    %c127_i32_46 = arith.constant 127 : i32
    %138 = tpu.dynamic_rotate %131 by %c127_i32_46 dim 1 : vector<8x128xf32>, i32 -> vector<8x128xf32>
    %139 = arith.mulf %83, %138 : vector<8x128xf32>
    %140 = arith.addf %139, %89 : vector<8x128xf32>
    %c1_i32_47 = arith.constant 1 : i32
    %141 = tpu.dynamic_rotate %131 by %c1_i32_47 dim 1 : vector<8x128xf32>, i32 -> vector<8x128xf32>
    %142 = arith.mulf %93, %141 : vector<8x128xf32>
    %143 = arith.addf %142, %99 : vector<8x128xf32>
    %144 = arith.maximumf %134, %137 : vector<8x128xf32>
    %145 = arith.maximumf %140, %143 : vector<8x128xf32>
    %146 = arith.maximumf %144, %145 : vector<8x128xf32>
    %147 = arith.maximumf %146, %131 : vector<8x128xf32>
    %c7_i32_48 = arith.constant 7 : i32
    %148 = tpu.dynamic_rotate %147 by %c7_i32_48 dim 0 : vector<8x128xf32>, i32 -> vector<8x128xf32>
    %149 = arith.mulf %63, %148 : vector<8x128xf32>
    %150 = arith.addf %149, %69 : vector<8x128xf32>
    %c1_i32_49 = arith.constant 1 : i32
    %151 = tpu.dynamic_rotate %147 by %c1_i32_49 dim 0 : vector<8x128xf32>, i32 -> vector<8x128xf32>
    %152 = arith.mulf %73, %151 : vector<8x128xf32>
    %153 = arith.addf %152, %79 : vector<8x128xf32>
    %c127_i32_50 = arith.constant 127 : i32
    %154 = tpu.dynamic_rotate %147 by %c127_i32_50 dim 1 : vector<8x128xf32>, i32 -> vector<8x128xf32>
    %155 = arith.mulf %83, %154 : vector<8x128xf32>
    %156 = arith.addf %155, %89 : vector<8x128xf32>
    %c1_i32_51 = arith.constant 1 : i32
    %157 = tpu.dynamic_rotate %147 by %c1_i32_51 dim 1 : vector<8x128xf32>, i32 -> vector<8x128xf32>
    %158 = arith.mulf %93, %157 : vector<8x128xf32>
    %159 = arith.addf %158, %99 : vector<8x128xf32>
    %160 = arith.maximumf %150, %153 : vector<8x128xf32>
    %161 = arith.maximumf %156, %159 : vector<8x128xf32>
    %162 = arith.maximumf %160, %161 : vector<8x128xf32>
    %163 = arith.maximumf %162, %147 : vector<8x128xf32>
    %c7_i32_52 = arith.constant 7 : i32
    %164 = tpu.dynamic_rotate %163 by %c7_i32_52 dim 0 : vector<8x128xf32>, i32 -> vector<8x128xf32>
    %165 = arith.mulf %63, %164 : vector<8x128xf32>
    %166 = arith.addf %165, %69 : vector<8x128xf32>
    %c1_i32_53 = arith.constant 1 : i32
    %167 = tpu.dynamic_rotate %163 by %c1_i32_53 dim 0 : vector<8x128xf32>, i32 -> vector<8x128xf32>
    %168 = arith.mulf %73, %167 : vector<8x128xf32>
    %169 = arith.addf %168, %79 : vector<8x128xf32>
    %c127_i32_54 = arith.constant 127 : i32
    %170 = tpu.dynamic_rotate %163 by %c127_i32_54 dim 1 : vector<8x128xf32>, i32 -> vector<8x128xf32>
    %171 = arith.mulf %83, %170 : vector<8x128xf32>
    %172 = arith.addf %171, %89 : vector<8x128xf32>
    %c1_i32_55 = arith.constant 1 : i32
    %173 = tpu.dynamic_rotate %163 by %c1_i32_55 dim 1 : vector<8x128xf32>, i32 -> vector<8x128xf32>
    %174 = arith.mulf %93, %173 : vector<8x128xf32>
    %175 = arith.addf %174, %99 : vector<8x128xf32>
    %176 = arith.maximumf %166, %169 : vector<8x128xf32>
    %177 = arith.maximumf %172, %175 : vector<8x128xf32>
    %178 = arith.maximumf %176, %177 : vector<8x128xf32>
    %179 = arith.maximumf %178, %163 : vector<8x128xf32>
    %c7_i32_56 = arith.constant 7 : i32
    %180 = tpu.dynamic_rotate %179 by %c7_i32_56 dim 0 : vector<8x128xf32>, i32 -> vector<8x128xf32>
    %181 = arith.mulf %63, %180 : vector<8x128xf32>
    %182 = arith.addf %181, %69 : vector<8x128xf32>
    %c1_i32_57 = arith.constant 1 : i32
    %183 = tpu.dynamic_rotate %179 by %c1_i32_57 dim 0 : vector<8x128xf32>, i32 -> vector<8x128xf32>
    %184 = arith.mulf %73, %183 : vector<8x128xf32>
    %185 = arith.addf %184, %79 : vector<8x128xf32>
    %c127_i32_58 = arith.constant 127 : i32
    %186 = tpu.dynamic_rotate %179 by %c127_i32_58 dim 1 : vector<8x128xf32>, i32 -> vector<8x128xf32>
    %187 = arith.mulf %83, %186 : vector<8x128xf32>
    %188 = arith.addf %187, %89 : vector<8x128xf32>
    %c1_i32_59 = arith.constant 1 : i32
    %189 = tpu.dynamic_rotate %179 by %c1_i32_59 dim 1 : vector<8x128xf32>, i32 -> vector<8x128xf32>
    %190 = arith.mulf %93, %189 : vector<8x128xf32>
    %191 = arith.addf %190, %99 : vector<8x128xf32>
    %192 = arith.maximumf %182, %185 : vector<8x128xf32>
    %193 = arith.maximumf %188, %191 : vector<8x128xf32>
    %194 = arith.maximumf %192, %193 : vector<8x128xf32>
    %195 = arith.maximumf %194, %179 : vector<8x128xf32>
    %c7_i32_60 = arith.constant 7 : i32
    %196 = tpu.dynamic_rotate %195 by %c7_i32_60 dim 0 : vector<8x128xf32>, i32 -> vector<8x128xf32>
    %197 = arith.mulf %63, %196 : vector<8x128xf32>
    %198 = arith.addf %197, %69 : vector<8x128xf32>
    %c1_i32_61 = arith.constant 1 : i32
    %199 = tpu.dynamic_rotate %195 by %c1_i32_61 dim 0 : vector<8x128xf32>, i32 -> vector<8x128xf32>
    %200 = arith.mulf %73, %199 : vector<8x128xf32>
    %201 = arith.addf %200, %79 : vector<8x128xf32>
    %c127_i32_62 = arith.constant 127 : i32
    %202 = tpu.dynamic_rotate %195 by %c127_i32_62 dim 1 : vector<8x128xf32>, i32 -> vector<8x128xf32>
    %203 = arith.mulf %83, %202 : vector<8x128xf32>
    %204 = arith.addf %203, %89 : vector<8x128xf32>
    %c1_i32_63 = arith.constant 1 : i32
    %205 = tpu.dynamic_rotate %195 by %c1_i32_63 dim 1 : vector<8x128xf32>, i32 -> vector<8x128xf32>
    %206 = arith.mulf %93, %205 : vector<8x128xf32>
    %207 = arith.addf %206, %99 : vector<8x128xf32>
    %208 = arith.maximumf %198, %201 : vector<8x128xf32>
    %209 = arith.maximumf %204, %207 : vector<8x128xf32>
    %210 = arith.maximumf %208, %209 : vector<8x128xf32>
    %211 = arith.maximumf %210, %195 : vector<8x128xf32>
    %c7_i32_64 = arith.constant 7 : i32
    %212 = tpu.dynamic_rotate %211 by %c7_i32_64 dim 0 : vector<8x128xf32>, i32 -> vector<8x128xf32>
    %213 = arith.mulf %63, %212 : vector<8x128xf32>
    %214 = arith.addf %213, %69 : vector<8x128xf32>
    %c1_i32_65 = arith.constant 1 : i32
    %215 = tpu.dynamic_rotate %211 by %c1_i32_65 dim 0 : vector<8x128xf32>, i32 -> vector<8x128xf32>
    %216 = arith.mulf %73, %215 : vector<8x128xf32>
    %217 = arith.addf %216, %79 : vector<8x128xf32>
    %c127_i32_66 = arith.constant 127 : i32
    %218 = tpu.dynamic_rotate %211 by %c127_i32_66 dim 1 : vector<8x128xf32>, i32 -> vector<8x128xf32>
    %219 = arith.mulf %83, %218 : vector<8x128xf32>
    %220 = arith.addf %219, %89 : vector<8x128xf32>
    %c1_i32_67 = arith.constant 1 : i32
    %221 = tpu.dynamic_rotate %211 by %c1_i32_67 dim 1 : vector<8x128xf32>, i32 -> vector<8x128xf32>
    %222 = arith.mulf %93, %221 : vector<8x128xf32>
    %223 = arith.addf %222, %99 : vector<8x128xf32>
    %224 = arith.maximumf %214, %217 : vector<8x128xf32>
    %225 = arith.maximumf %220, %223 : vector<8x128xf32>
    %226 = arith.maximumf %224, %225 : vector<8x128xf32>
    %227 = arith.maximumf %226, %211 : vector<8x128xf32>
    %c7_i32_68 = arith.constant 7 : i32
    %228 = tpu.dynamic_rotate %227 by %c7_i32_68 dim 0 : vector<8x128xf32>, i32 -> vector<8x128xf32>
    %229 = arith.mulf %63, %228 : vector<8x128xf32>
    %230 = arith.addf %229, %69 : vector<8x128xf32>
    %c1_i32_69 = arith.constant 1 : i32
    %231 = tpu.dynamic_rotate %227 by %c1_i32_69 dim 0 : vector<8x128xf32>, i32 -> vector<8x128xf32>
    %232 = arith.mulf %73, %231 : vector<8x128xf32>
    %233 = arith.addf %232, %79 : vector<8x128xf32>
    %c127_i32_70 = arith.constant 127 : i32
    %234 = tpu.dynamic_rotate %227 by %c127_i32_70 dim 1 : vector<8x128xf32>, i32 -> vector<8x128xf32>
    %235 = arith.mulf %83, %234 : vector<8x128xf32>
    %236 = arith.addf %235, %89 : vector<8x128xf32>
    %c1_i32_71 = arith.constant 1 : i32
    %237 = tpu.dynamic_rotate %227 by %c1_i32_71 dim 1 : vector<8x128xf32>, i32 -> vector<8x128xf32>
    %238 = arith.mulf %93, %237 : vector<8x128xf32>
    %239 = arith.addf %238, %99 : vector<8x128xf32>
    %240 = arith.maximumf %230, %233 : vector<8x128xf32>
    %241 = arith.maximumf %236, %239 : vector<8x128xf32>
    %242 = arith.maximumf %240, %241 : vector<8x128xf32>
    %243 = arith.maximumf %242, %227 : vector<8x128xf32>
    %c7_i32_72 = arith.constant 7 : i32
    %244 = tpu.dynamic_rotate %243 by %c7_i32_72 dim 0 : vector<8x128xf32>, i32 -> vector<8x128xf32>
    %245 = arith.mulf %63, %244 : vector<8x128xf32>
    %246 = arith.addf %245, %69 : vector<8x128xf32>
    %c1_i32_73 = arith.constant 1 : i32
    %247 = tpu.dynamic_rotate %243 by %c1_i32_73 dim 0 : vector<8x128xf32>, i32 -> vector<8x128xf32>
    %248 = arith.mulf %73, %247 : vector<8x128xf32>
    %249 = arith.addf %248, %79 : vector<8x128xf32>
    %c127_i32_74 = arith.constant 127 : i32
    %250 = tpu.dynamic_rotate %243 by %c127_i32_74 dim 1 : vector<8x128xf32>, i32 -> vector<8x128xf32>
    %251 = arith.mulf %83, %250 : vector<8x128xf32>
    %252 = arith.addf %251, %89 : vector<8x128xf32>
    %c1_i32_75 = arith.constant 1 : i32
    %253 = tpu.dynamic_rotate %243 by %c1_i32_75 dim 1 : vector<8x128xf32>, i32 -> vector<8x128xf32>
    %254 = arith.mulf %93, %253 : vector<8x128xf32>
    %255 = arith.addf %254, %99 : vector<8x128xf32>
    %256 = arith.maximumf %246, %249 : vector<8x128xf32>
    %257 = arith.maximumf %252, %255 : vector<8x128xf32>
    %258 = arith.maximumf %256, %257 : vector<8x128xf32>
    %259 = arith.maximumf %258, %243 : vector<8x128xf32>
    %c7_i32_76 = arith.constant 7 : i32
    %260 = tpu.dynamic_rotate %7 by %c7_i32_76 dim 0 : vector<8x128xf32>, i32 -> vector<8x128xf32>
    %c127_i32_77 = arith.constant 127 : i32
    %261 = tpu.dynamic_rotate %260 by %c127_i32_77 dim 1 : vector<8x128xf32>, i32 -> vector<8x128xf32>
    %c7_i32_78 = arith.constant 7 : i32
    %262 = vector.broadcast %c7_i32_78 : i32 to vector<8x128xi32>
    %263 = arith.cmpi slt, %8, %262 : vector<8x128xi32>
    %c7_i32_79 = arith.constant 7 : i32
    %264 = vector.broadcast %c7_i32_79 : i32 to vector<8x128xi32>
    %265 = arith.cmpi slt, %11, %264 : vector<8x128xi32>
    %266 = arith.andi %263, %265 : vector<8x128xi1>
    %cst_80 = arith.constant 0.000000e+00 : f32
    %267 = vector.broadcast %cst_80 : f32 to vector<8x128xf32>
    %268 = arith.select %266, %261, %267 : vector<8x128xi1>, vector<8x128xf32>
    %c7_i32_81 = arith.constant 7 : i32
    %269 = tpu.dynamic_rotate %7 by %c7_i32_81 dim 0 : vector<8x128xf32>, i32 -> vector<8x128xf32>
    %c7_i32_82 = arith.constant 7 : i32
    %270 = vector.broadcast %c7_i32_82 : i32 to vector<8x128xi32>
    %271 = arith.cmpi slt, %8, %270 : vector<8x128xi32>
    %cst_83 = arith.constant 0.000000e+00 : f32
    %272 = vector.broadcast %cst_83 : f32 to vector<8x128xf32>
    %273 = arith.select %271, %269, %272 : vector<8x128xi1>, vector<8x128xf32>
    %c7_i32_84 = arith.constant 7 : i32
    %274 = tpu.dynamic_rotate %7 by %c7_i32_84 dim 0 : vector<8x128xf32>, i32 -> vector<8x128xf32>
    %c1_i32_85 = arith.constant 1 : i32
    %275 = tpu.dynamic_rotate %274 by %c1_i32_85 dim 1 : vector<8x128xf32>, i32 -> vector<8x128xf32>
    %c7_i32_86 = arith.constant 7 : i32
    %276 = vector.broadcast %c7_i32_86 : i32 to vector<8x128xi32>
    %277 = arith.cmpi slt, %8, %276 : vector<8x128xi32>
    %c1_i32_87 = arith.constant 1 : i32
    %278 = vector.broadcast %c1_i32_87 : i32 to vector<8x128xi32>
    %279 = arith.cmpi sge, %11, %278 : vector<8x128xi32>
    %280 = arith.andi %277, %279 : vector<8x128xi1>
    %cst_88 = arith.constant 0.000000e+00 : f32
    %281 = vector.broadcast %cst_88 : f32 to vector<8x128xf32>
    %282 = arith.select %280, %275, %281 : vector<8x128xi1>, vector<8x128xf32>
    %c127_i32_89 = arith.constant 127 : i32
    %283 = tpu.dynamic_rotate %7 by %c127_i32_89 dim 1 : vector<8x128xf32>, i32 -> vector<8x128xf32>
    %c7_i32_90 = arith.constant 7 : i32
    %284 = vector.broadcast %c7_i32_90 : i32 to vector<8x128xi32>
    %285 = arith.cmpi slt, %11, %284 : vector<8x128xi32>
    %cst_91 = arith.constant 0.000000e+00 : f32
    %286 = vector.broadcast %cst_91 : f32 to vector<8x128xf32>
    %287 = arith.select %285, %283, %286 : vector<8x128xi1>, vector<8x128xf32>
    %c1_i32_92 = arith.constant 1 : i32
    %288 = tpu.dynamic_rotate %7 by %c1_i32_92 dim 1 : vector<8x128xf32>, i32 -> vector<8x128xf32>
    %c1_i32_93 = arith.constant 1 : i32
    %289 = vector.broadcast %c1_i32_93 : i32 to vector<8x128xi32>
    %290 = arith.cmpi sge, %11, %289 : vector<8x128xi32>
    %cst_94 = arith.constant 0.000000e+00 : f32
    %291 = vector.broadcast %cst_94 : f32 to vector<8x128xf32>
    %292 = arith.select %290, %288, %291 : vector<8x128xi1>, vector<8x128xf32>
    %c1_i32_95 = arith.constant 1 : i32
    %293 = tpu.dynamic_rotate %7 by %c1_i32_95 dim 0 : vector<8x128xf32>, i32 -> vector<8x128xf32>
    %c127_i32_96 = arith.constant 127 : i32
    %294 = tpu.dynamic_rotate %293 by %c127_i32_96 dim 1 : vector<8x128xf32>, i32 -> vector<8x128xf32>
    %c1_i32_97 = arith.constant 1 : i32
    %295 = vector.broadcast %c1_i32_97 : i32 to vector<8x128xi32>
    %296 = arith.cmpi sge, %8, %295 : vector<8x128xi32>
    %c7_i32_98 = arith.constant 7 : i32
    %297 = vector.broadcast %c7_i32_98 : i32 to vector<8x128xi32>
    %298 = arith.cmpi slt, %11, %297 : vector<8x128xi32>
    %299 = arith.andi %296, %298 : vector<8x128xi1>
    %cst_99 = arith.constant 0.000000e+00 : f32
    %300 = vector.broadcast %cst_99 : f32 to vector<8x128xf32>
    %301 = arith.select %299, %294, %300 : vector<8x128xi1>, vector<8x128xf32>
    %c1_i32_100 = arith.constant 1 : i32
    %302 = tpu.dynamic_rotate %7 by %c1_i32_100 dim 0 : vector<8x128xf32>, i32 -> vector<8x128xf32>
    %c1_i32_101 = arith.constant 1 : i32
    %303 = vector.broadcast %c1_i32_101 : i32 to vector<8x128xi32>
    %304 = arith.cmpi sge, %8, %303 : vector<8x128xi32>
    %cst_102 = arith.constant 0.000000e+00 : f32
    %305 = vector.broadcast %cst_102 : f32 to vector<8x128xf32>
    %306 = arith.select %304, %302, %305 : vector<8x128xi1>, vector<8x128xf32>
    %c1_i32_103 = arith.constant 1 : i32
    %307 = tpu.dynamic_rotate %7 by %c1_i32_103 dim 0 : vector<8x128xf32>, i32 -> vector<8x128xf32>
    %c1_i32_104 = arith.constant 1 : i32
    %308 = tpu.dynamic_rotate %307 by %c1_i32_104 dim 1 : vector<8x128xf32>, i32 -> vector<8x128xf32>
    %c1_i32_105 = arith.constant 1 : i32
    %309 = vector.broadcast %c1_i32_105 : i32 to vector<8x128xi32>
    %310 = arith.cmpi sge, %8, %309 : vector<8x128xi32>
    %c1_i32_106 = arith.constant 1 : i32
    %311 = vector.broadcast %c1_i32_106 : i32 to vector<8x128xi32>
    %312 = arith.cmpi sge, %11, %311 : vector<8x128xi32>
    %313 = arith.andi %310, %312 : vector<8x128xi1>
    %cst_107 = arith.constant 0.000000e+00 : f32
    %314 = vector.broadcast %cst_107 : f32 to vector<8x128xf32>
    %315 = arith.select %313, %308, %314 : vector<8x128xi1>, vector<8x128xf32>
    %cst_108 = arith.constant 1.000000e+00 : f32
    %316 = vector.broadcast %cst_108 : f32 to vector<8x128xf32>
    %317 = arith.subf %316, %1 : vector<8x128xf32>
    %318 = arith.mulf %268, %317 : vector<8x128xf32>
    %cst_109 = arith.constant dense<0.000000e+00> : vector<128xf32>
    %319 = vector.multi_reduction <add>, %318, %cst_109 [0] : vector<8x128xf32> to vector<128xf32>
    %320 = vector.shape_cast %319 : vector<128xf32> to vector<1x128xf32>
    %321 = arith.mulf %273, %317 : vector<8x128xf32>
    %cst_110 = arith.constant dense<0.000000e+00> : vector<128xf32>
    %322 = vector.multi_reduction <add>, %321, %cst_110 [0] : vector<8x128xf32> to vector<128xf32>
    %323 = vector.shape_cast %322 : vector<128xf32> to vector<1x128xf32>
    %324 = arith.mulf %282, %317 : vector<8x128xf32>
    %cst_111 = arith.constant dense<0.000000e+00> : vector<128xf32>
    %325 = vector.multi_reduction <add>, %324, %cst_111 [0] : vector<8x128xf32> to vector<128xf32>
    %326 = vector.shape_cast %325 : vector<128xf32> to vector<1x128xf32>
    %327 = arith.mulf %287, %317 : vector<8x128xf32>
    %cst_112 = arith.constant dense<0.000000e+00> : vector<128xf32>
    %328 = vector.multi_reduction <add>, %327, %cst_112 [0] : vector<8x128xf32> to vector<128xf32>
    %329 = vector.shape_cast %328 : vector<128xf32> to vector<1x128xf32>
    %330 = arith.mulf %7, %317 : vector<8x128xf32>
    %cst_113 = arith.constant dense<0.000000e+00> : vector<128xf32>
    %331 = vector.multi_reduction <add>, %330, %cst_113 [0] : vector<8x128xf32> to vector<128xf32>
    %332 = vector.shape_cast %331 : vector<128xf32> to vector<1x128xf32>
    %333 = arith.mulf %292, %317 : vector<8x128xf32>
    %cst_114 = arith.constant dense<0.000000e+00> : vector<128xf32>
    %334 = vector.multi_reduction <add>, %333, %cst_114 [0] : vector<8x128xf32> to vector<128xf32>
    %335 = vector.shape_cast %334 : vector<128xf32> to vector<1x128xf32>
    %336 = arith.mulf %301, %317 : vector<8x128xf32>
    %cst_115 = arith.constant dense<0.000000e+00> : vector<128xf32>
    %337 = vector.multi_reduction <add>, %336, %cst_115 [0] : vector<8x128xf32> to vector<128xf32>
    %338 = vector.shape_cast %337 : vector<128xf32> to vector<1x128xf32>
    %339 = arith.mulf %306, %317 : vector<8x128xf32>
    %cst_116 = arith.constant dense<0.000000e+00> : vector<128xf32>
    %340 = vector.multi_reduction <add>, %339, %cst_116 [0] : vector<8x128xf32> to vector<128xf32>
    %341 = vector.shape_cast %340 : vector<128xf32> to vector<1x128xf32>
    %342 = arith.mulf %315, %317 : vector<8x128xf32>
    %cst_117 = arith.constant dense<0.000000e+00> : vector<128xf32>
    %343 = vector.multi_reduction <add>, %342, %cst_117 [0] : vector<8x128xf32> to vector<128xf32>
    %344 = vector.shape_cast %343 : vector<128xf32> to vector<1x128xf32>
    %345 = arith.mulf %268, %3 : vector<8x128xf32>
    %cst_118 = arith.constant dense<0.000000e+00> : vector<128xf32>
    %346 = vector.multi_reduction <add>, %345, %cst_118 [0] : vector<8x128xf32> to vector<128xf32>
    %347 = vector.shape_cast %346 : vector<128xf32> to vector<1x128xf32>
    %348 = arith.mulf %273, %3 : vector<8x128xf32>
    %cst_119 = arith.constant dense<0.000000e+00> : vector<128xf32>
    %349 = vector.multi_reduction <add>, %348, %cst_119 [0] : vector<8x128xf32> to vector<128xf32>
    %350 = vector.shape_cast %349 : vector<128xf32> to vector<1x128xf32>
    %351 = arith.mulf %282, %3 : vector<8x128xf32>
    %cst_120 = arith.constant dense<0.000000e+00> : vector<128xf32>
    %352 = vector.multi_reduction <add>, %351, %cst_120 [0] : vector<8x128xf32> to vector<128xf32>
    %353 = vector.shape_cast %352 : vector<128xf32> to vector<1x128xf32>
    %354 = arith.mulf %287, %3 : vector<8x128xf32>
    %cst_121 = arith.constant dense<0.000000e+00> : vector<128xf32>
    %355 = vector.multi_reduction <add>, %354, %cst_121 [0] : vector<8x128xf32> to vector<128xf32>
    %356 = vector.shape_cast %355 : vector<128xf32> to vector<1x128xf32>
    %357 = arith.mulf %7, %3 : vector<8x128xf32>
    %cst_122 = arith.constant dense<0.000000e+00> : vector<128xf32>
    %358 = vector.multi_reduction <add>, %357, %cst_122 [0] : vector<8x128xf32> to vector<128xf32>
    %359 = vector.shape_cast %358 : vector<128xf32> to vector<1x128xf32>
    %360 = arith.mulf %292, %3 : vector<8x128xf32>
    %cst_123 = arith.constant dense<0.000000e+00> : vector<128xf32>
    %361 = vector.multi_reduction <add>, %360, %cst_123 [0] : vector<8x128xf32> to vector<128xf32>
    %362 = vector.shape_cast %361 : vector<128xf32> to vector<1x128xf32>
    %363 = arith.mulf %301, %3 : vector<8x128xf32>
    %cst_124 = arith.constant dense<0.000000e+00> : vector<128xf32>
    %364 = vector.multi_reduction <add>, %363, %cst_124 [0] : vector<8x128xf32> to vector<128xf32>
    %365 = vector.shape_cast %364 : vector<128xf32> to vector<1x128xf32>
    %366 = arith.mulf %306, %3 : vector<8x128xf32>
    %cst_125 = arith.constant dense<0.000000e+00> : vector<128xf32>
    %367 = vector.multi_reduction <add>, %366, %cst_125 [0] : vector<8x128xf32> to vector<128xf32>
    %368 = vector.shape_cast %367 : vector<128xf32> to vector<1x128xf32>
    %369 = arith.mulf %315, %3 : vector<8x128xf32>
    %cst_126 = arith.constant dense<0.000000e+00> : vector<128xf32>
    %370 = vector.multi_reduction <add>, %369, %cst_126 [0] : vector<8x128xf32> to vector<128xf32>
    %371 = vector.shape_cast %370 : vector<128xf32> to vector<1x128xf32>
    %372 = arith.mulf %268, %5 : vector<8x128xf32>
    %cst_127 = arith.constant dense<0.000000e+00> : vector<128xf32>
    %373 = vector.multi_reduction <add>, %372, %cst_127 [0] : vector<8x128xf32> to vector<128xf32>
    %374 = vector.shape_cast %373 : vector<128xf32> to vector<1x128xf32>
    %375 = arith.mulf %273, %5 : vector<8x128xf32>
    %cst_128 = arith.constant dense<0.000000e+00> : vector<128xf32>
    %376 = vector.multi_reduction <add>, %375, %cst_128 [0] : vector<8x128xf32> to vector<128xf32>
    %377 = vector.shape_cast %376 : vector<128xf32> to vector<1x128xf32>
    %378 = arith.mulf %282, %5 : vector<8x128xf32>
    %cst_129 = arith.constant dense<0.000000e+00> : vector<128xf32>
    %379 = vector.multi_reduction <add>, %378, %cst_129 [0] : vector<8x128xf32> to vector<128xf32>
    %380 = vector.shape_cast %379 : vector<128xf32> to vector<1x128xf32>
    %381 = arith.mulf %287, %5 : vector<8x128xf32>
    %cst_130 = arith.constant dense<0.000000e+00> : vector<128xf32>
    %382 = vector.multi_reduction <add>, %381, %cst_130 [0] : vector<8x128xf32> to vector<128xf32>
    %383 = vector.shape_cast %382 : vector<128xf32> to vector<1x128xf32>
    %384 = arith.mulf %7, %5 : vector<8x128xf32>
    %cst_131 = arith.constant dense<0.000000e+00> : vector<128xf32>
    %385 = vector.multi_reduction <add>, %384, %cst_131 [0] : vector<8x128xf32> to vector<128xf32>
    %386 = vector.shape_cast %385 : vector<128xf32> to vector<1x128xf32>
    %387 = arith.mulf %292, %5 : vector<8x128xf32>
    %cst_132 = arith.constant dense<0.000000e+00> : vector<128xf32>
    %388 = vector.multi_reduction <add>, %387, %cst_132 [0] : vector<8x128xf32> to vector<128xf32>
    %389 = vector.shape_cast %388 : vector<128xf32> to vector<1x128xf32>
    %390 = arith.mulf %301, %5 : vector<8x128xf32>
    %cst_133 = arith.constant dense<0.000000e+00> : vector<128xf32>
    %391 = vector.multi_reduction <add>, %390, %cst_133 [0] : vector<8x128xf32> to vector<128xf32>
    %392 = vector.shape_cast %391 : vector<128xf32> to vector<1x128xf32>
    %393 = arith.mulf %306, %5 : vector<8x128xf32>
    %cst_134 = arith.constant dense<0.000000e+00> : vector<128xf32>
    %394 = vector.multi_reduction <add>, %393, %cst_134 [0] : vector<8x128xf32> to vector<128xf32>
    %395 = vector.shape_cast %394 : vector<128xf32> to vector<1x128xf32>
    %396 = arith.mulf %315, %5 : vector<8x128xf32>
    %cst_135 = arith.constant dense<0.000000e+00> : vector<128xf32>
    %397 = vector.multi_reduction <add>, %396, %cst_135 [0] : vector<8x128xf32> to vector<128xf32>
    %398 = vector.shape_cast %397 : vector<128xf32> to vector<1x128xf32>
    %399 = arith.mulf %268, %259 : vector<8x128xf32>
    %cst_136 = arith.constant dense<0.000000e+00> : vector<128xf32>
    %400 = vector.multi_reduction <add>, %399, %cst_136 [0] : vector<8x128xf32> to vector<128xf32>
    %401 = vector.shape_cast %400 : vector<128xf32> to vector<1x128xf32>
    %402 = arith.mulf %273, %259 : vector<8x128xf32>
    %cst_137 = arith.constant dense<0.000000e+00> : vector<128xf32>
    %403 = vector.multi_reduction <add>, %402, %cst_137 [0] : vector<8x128xf32> to vector<128xf32>
    %404 = vector.shape_cast %403 : vector<128xf32> to vector<1x128xf32>
    %405 = arith.mulf %282, %259 : vector<8x128xf32>
    %cst_138 = arith.constant dense<0.000000e+00> : vector<128xf32>
    %406 = vector.multi_reduction <add>, %405, %cst_138 [0] : vector<8x128xf32> to vector<128xf32>
    %407 = vector.shape_cast %406 : vector<128xf32> to vector<1x128xf32>
    %408 = arith.mulf %287, %259 : vector<8x128xf32>
    %cst_139 = arith.constant dense<0.000000e+00> : vector<128xf32>
    %409 = vector.multi_reduction <add>, %408, %cst_139 [0] : vector<8x128xf32> to vector<128xf32>
    %410 = vector.shape_cast %409 : vector<128xf32> to vector<1x128xf32>
    %411 = arith.mulf %7, %259 : vector<8x128xf32>
    %cst_140 = arith.constant dense<0.000000e+00> : vector<128xf32>
    %412 = vector.multi_reduction <add>, %411, %cst_140 [0] : vector<8x128xf32> to vector<128xf32>
    %413 = vector.shape_cast %412 : vector<128xf32> to vector<1x128xf32>
    %414 = arith.mulf %292, %259 : vector<8x128xf32>
    %cst_141 = arith.constant dense<0.000000e+00> : vector<128xf32>
    %415 = vector.multi_reduction <add>, %414, %cst_141 [0] : vector<8x128xf32> to vector<128xf32>
    %416 = vector.shape_cast %415 : vector<128xf32> to vector<1x128xf32>
    %417 = arith.mulf %301, %259 : vector<8x128xf32>
    %cst_142 = arith.constant dense<0.000000e+00> : vector<128xf32>
    %418 = vector.multi_reduction <add>, %417, %cst_142 [0] : vector<8x128xf32> to vector<128xf32>
    %419 = vector.shape_cast %418 : vector<128xf32> to vector<1x128xf32>
    %420 = arith.mulf %306, %259 : vector<8x128xf32>
    %cst_143 = arith.constant dense<0.000000e+00> : vector<128xf32>
    %421 = vector.multi_reduction <add>, %420, %cst_143 [0] : vector<8x128xf32> to vector<128xf32>
    %422 = vector.shape_cast %421 : vector<128xf32> to vector<1x128xf32>
    %423 = arith.mulf %315, %259 : vector<8x128xf32>
    %cst_144 = arith.constant dense<0.000000e+00> : vector<128xf32>
    %424 = vector.multi_reduction <add>, %423, %cst_144 [0] : vector<8x128xf32> to vector<128xf32>
    %425 = vector.shape_cast %424 : vector<128xf32> to vector<1x128xf32>
    %426 = tpu.concatenate %320, %323, %326, %329, %332, %335, %338, %341, %344, %347, %350, %353, %356, %359, %362, %365 in 0 : vector<1x128xf32>, vector<1x128xf32>, vector<1x128xf32>, vector<1x128xf32>, vector<1x128xf32>, vector<1x128xf32>, vector<1x128xf32>, vector<1x128xf32>, vector<1x128xf32>, vector<1x128xf32>, vector<1x128xf32>, vector<1x128xf32>, vector<1x128xf32>, vector<1x128xf32>, vector<1x128xf32>, vector<1x128xf32> -> vector<16x128xf32>
    %427 = tpu.concatenate %368, %371, %374, %377, %380, %383, %386, %389, %392, %395, %398, %401, %404, %407, %410, %413 in 0 : vector<1x128xf32>, vector<1x128xf32>, vector<1x128xf32>, vector<1x128xf32>, vector<1x128xf32>, vector<1x128xf32>, vector<1x128xf32>, vector<1x128xf32>, vector<1x128xf32>, vector<1x128xf32>, vector<1x128xf32>, vector<1x128xf32>, vector<1x128xf32>, vector<1x128xf32>, vector<1x128xf32>, vector<1x128xf32> -> vector<16x128xf32>
    %428 = tpu.concatenate %416, %419, %422, %425 in 0 : vector<1x128xf32>, vector<1x128xf32>, vector<1x128xf32>, vector<1x128xf32> -> vector<4x128xf32>
    %429 = tpu.concatenate %426, %427, %428 in 0 : vector<16x128xf32>, vector<16x128xf32>, vector<4x128xf32> -> vector<36x128xf32>
    %c0_145 = arith.constant 0 : index
    %c0_146 = arith.constant 0 : index
    %430 = vector.load %arg4[%c0_145, %c0_146] : memref<128x16xf32, #tpu.memory_space<vmem>>, vector<128x16xf32>
    %cst_147 = arith.constant dense<0.000000e+00> : vector<36x16xf32>
    %431 = tpu.matmul %429, %430, %cst_147 {dimension_numbers = #tpu.dot_dimension_numbers<[1], [0], [0], [1], [0, 0, 1, 1], [], []>} : vector<36x128xf32>, vector<128x16xf32>, vector<36x16xf32> -> vector<36x16xf32>
    %432 = vector.extract_strided_slice %431 {offsets = [0, 0], sizes = [9, 16], strides = [1, 1]} : vector<36x16xf32> to vector<9x16xf32>
    %cst_148 = arith.constant 1.000000e+00 : f32
    %433 = vector.broadcast %cst_148 : f32 to vector<9x16xf32>
    %434 = arith.subf %433, %432 : vector<9x16xf32>
    %435 = vector.extract_strided_slice %431 {offsets = [9, 0], sizes = [27, 16], strides = [1, 1]} : vector<36x16xf32> to vector<27x16xf32>
    %436 = tpu.concatenate %434, %435 in 0 : vector<9x16xf32>, vector<27x16xf32> -> vector<36x16xf32>
    %c0_149 = arith.constant 0 : index
    %c0_150 = arith.constant 0 : index
    %437 = vector.load %arg5[%c0_149, %c0_150] : memref<32x36xf32, #tpu.memory_space<vmem>>, vector<32x36xf32>
    %cst_151 = arith.constant dense<0.000000e+00> : vector<32x16xf32>
    %438 = tpu.matmul %437, %436, %cst_151 {dimension_numbers = #tpu.dot_dimension_numbers<[1], [0], [0], [1], [0, 0, 1, 1], [], []>} : vector<32x36xf32>, vector<36x16xf32>, vector<32x16xf32> -> vector<32x16xf32>
    %c0_152 = arith.constant 0 : index
    %c0_153 = arith.constant 0 : index
    %439 = vector.load %arg6[%c0_152, %c0_153] : memref<32x1xf32, #tpu.memory_space<vmem>>, vector<32x1xf32>
    %440 = vector.broadcast %439 : vector<32x1xf32> to vector<32x16xf32>
    %441 = arith.addf %438, %440 : vector<32x16xf32>
    %c0_154 = arith.constant 0 : index
    %c0_155 = arith.constant 0 : index
    %442 = vector.load %arg7[%c0_154, %c0_155] : memref<32x32xf32, #tpu.memory_space<vmem>>, vector<32x32xf32>
    %cst_156 = arith.constant dense<0.000000e+00> : vector<32x16xf32>
    %443 = tpu.matmul %442, %441, %cst_156 {dimension_numbers = #tpu.dot_dimension_numbers<[1], [0], [0], [1], [0, 0, 1, 1], [], []>} : vector<32x32xf32>, vector<32x16xf32>, vector<32x16xf32> -> vector<32x16xf32>
    %c0_157 = arith.constant 0 : index
    %c0_158 = arith.constant 0 : index
    %444 = vector.load %arg8[%c0_157, %c0_158] : memref<32x1xf32, #tpu.memory_space<vmem>>, vector<32x1xf32>
    %445 = vector.broadcast %444 : vector<32x1xf32> to vector<32x16xf32>
    %446 = arith.addf %443, %445 : vector<32x16xf32>
    %c0_159 = arith.constant 0 : index
    %c0_160 = arith.constant 0 : index
    %447 = vector.load %arg9[%c0_159, %c0_160] : memref<5x32xf32, #tpu.memory_space<vmem>>, vector<5x32xf32>
    %cst_161 = arith.constant dense<0.000000e+00> : vector<5x16xf32>
    %448 = tpu.matmul %447, %446, %cst_161 {dimension_numbers = #tpu.dot_dimension_numbers<[1], [0], [0], [1], [0, 0, 1, 1], [], []>} : vector<5x32xf32>, vector<32x16xf32>, vector<5x16xf32> -> vector<5x16xf32>
    %c0_162 = arith.constant 0 : index
    %c0_163 = arith.constant 0 : index
    %449 = vector.load %arg10[%c0_162, %c0_163] : memref<5x1xf32, #tpu.memory_space<vmem>>, vector<5x1xf32>
    %450 = vector.broadcast %449 : vector<5x1xf32> to vector<5x16xf32>
    %451 = arith.addf %448, %450 : vector<5x16xf32>
    %c0_164 = arith.constant 0 : index
    %c0_165 = arith.constant 0 : index
    %c0_166 = arith.constant 0 : index
    %452 = vector.load %arg11[%c0_164, %c0_165, %c0_166] : memref<1x5x16xf32, #tpu.memory_space<vmem>>, vector<1x5x16xf32>
    %453 = vector.shape_cast %452 : vector<1x5x16xf32> to vector<5x16xf32>
    %454 = vector.shape_cast %451 : vector<5x16xf32> to vector<1x5x16xf32>
    tpu.vector_store %arg11[%c0_164, %c0_165, %c0_166], %454 {strides = array<i32>} : memref<1x5x16xf32, #tpu.memory_space<vmem>>, vector<1x5x16xf32>,
    %455 = vector.extract_strided_slice %431 {offsets = [31, 0], sizes = [1, 16], strides = [1, 1]} : vector<36x16xf32> to vector<1x16xf32>
    %c0_167 = arith.constant 0 : index
    %c0_168 = arith.constant 0 : index
    %c0_169 = arith.constant 0 : index
    %456 = vector.load %arg12[%c0_167, %c0_168, %c0_169] : memref<1x1x16xf32, #tpu.memory_space<vmem>>, vector<1x1x16xf32>
    %457 = vector.shape_cast %456 : vector<1x1x16xf32> to vector<1x16xf32>
    %458 = vector.shape_cast %455 : vector<1x16xf32> to vector<1x1x16xf32>
    tpu.vector_store %arg12[%c0_167, %c0_168, %c0_169], %458 {strides = array<i32>} : memref<1x1x16xf32, #tpu.memory_space<vmem>>, vector<1x1x16xf32>,
    return
  }
  func.func @transform_0(%arg0: i32) -> (i32, i32, i32) {
    %c0_i32 = arith.constant 0 : i32
    %c0_i32_0 = arith.constant 0 : i32
    %c0_i32_1 = arith.constant 0 : i32
    return %c0_i32, %c0_i32_0, %arg0 : i32, i32, i32
  }
  func.func @transform_1(%arg0: i32) -> i32 {
    %c0_i32 = arith.constant 0 : i32
    %c0_i32_0 = arith.constant 0 : i32
    return %c0_i32 : i32
  }
  func.func @transform_2(%arg0: i32) -> i32 {
    %c0_i32 = arith.constant 0 : i32
    %c0_i32_0 = arith.constant 0 : i32
    return %c0_i32 : i32
  }
  func.func @transform_3(%arg0: i32) -> (i32, i32) {
    %c0_i32 = arith.constant 0 : i32
    %c0_i32_0 = arith.constant 0 : i32
    %c0_i32_1 = arith.constant 0 : i32
    return %c0_i32, %c0_i32_0 : i32, i32
  }
  func.func @transform_4(%arg0: i32) -> (i32, i32) {
    %c0_i32 = arith.constant 0 : i32
    %c0_i32_0 = arith.constant 0 : i32
    %c0_i32_1 = arith.constant 0 : i32
    return %c0_i32, %c0_i32_0 : i32, i32
  }
  func.func @transform_5(%arg0: i32) -> (i32, i32) {
    %c0_i32 = arith.constant 0 : i32
    %c0_i32_0 = arith.constant 0 : i32
    %c0_i32_1 = arith.constant 0 : i32
    return %c0_i32, %c0_i32_0 : i32, i32
  }
  func.func @transform_6(%arg0: i32) -> (i32, i32) {
    %c0_i32 = arith.constant 0 : i32
    %c0_i32_0 = arith.constant 0 : i32
    %c0_i32_1 = arith.constant 0 : i32
    return %c0_i32, %c0_i32_0 : i32, i32
  }
  func.func @transform_7(%arg0: i32) -> (i32, i32) {
    %c0_i32 = arith.constant 0 : i32
    %c0_i32_0 = arith.constant 0 : i32
    %c0_i32_1 = arith.constant 0 : i32
    return %c0_i32, %c0_i32_0 : i32, i32
  }
  func.func @transform_8(%arg0: i32) -> (i32, i32) {
    %c0_i32 = arith.constant 0 : i32
    %c0_i32_0 = arith.constant 0 : i32
    %c0_i32_1 = arith.constant 0 : i32
    return %c0_i32, %c0_i32_0 : i32, i32
  }
  func.func @transform_9(%arg0: i32) -> (i32, i32) {
    %c0_i32 = arith.constant 0 : i32
    %c0_i32_0 = arith.constant 0 : i32
    %c0_i32_1 = arith.constant 0 : i32
    return %c0_i32, %c0_i32_0 : i32, i32
  }
  func.func @transform_10(%arg0: i32) -> (i32, i32, i32) {
    %c0_i32 = arith.constant 0 : i32
    %c0_i32_0 = arith.constant 0 : i32
    %c0_i32_1 = arith.constant 0 : i32
    return %arg0, %c0_i32, %c0_i32_0 : i32, i32, i32
  }
  func.func @transform_11(%arg0: i32) -> (i32, i32, i32) {
    %c0_i32 = arith.constant 0 : i32
    %c0_i32_0 = arith.constant 0 : i32
    %c0_i32_1 = arith.constant 0 : i32
    return %arg0, %c0_i32, %c0_i32_0 : i32, i32, i32
  }
}

</mosaic_0001>

<bundles_post_ra>
// kernel: vin_forward.1
= control target key start
LH: loop header
LB: loop body
LE: loop exit
PB: predicated region body
PF: predicated region fallthrough
CT: control target
= control target key end

     0   :  { %17 = vsyncpa [#allocation4], 0  ;;  %s2169_s0 = inlined_call_operand.vmem [shape: f32[4,8,256], index: 0, kind: input, shape index: {}]   ;;  %s2170_s1 = inlined_call_operand.vmem [shape: f32[9], index: 1, kind: input, shape index: {}]   ;;  %s2171_s2 = inlined_call_operand.vmem [shape: f32[3], index: 2, kind: input, shape index: {}]   ;;  %s2172_s3 = inlined_call_operand.vmem [shape: f32[128,16], index: 3, kind: input, shape index: {}]   ;;  %s2173_s4 = inlined_call_operand.vmem [shape: f32[32,36], index: 4, kind: input, shape index: {}]   ;;  %s2174_s5 = inlined_call_operand.vmem [shape: f32[32,1], index: 5, kind: input, shape index: {}]   ;;  %s2175_s6 = inlined_call_operand.vmem [shape: f32[32,32], index: 6, kind: input, shape index: {}]   ;;  %s2176_s7 = inlined_call_operand.vmem [shape: f32[32,1], index: 7, kind: input, shape index: {}]   ;;  %s2177_s8 = inlined_call_operand.vmem [shape: f32[5,32], index: 8, kind: input, shape index: {}]   ;;  %s2178_s9 = inlined_call_operand.vmem [shape: f32[5,1], index: 9, kind: input, shape index: {}]   ;;  %s2179_s10 = inlined_call_operand.vmem [shape: f32[2,5,16], index: 10, kind: output, shape index: {0}]   ;;  %s2180_s11 = inlined_call_operand.vmem [shape: f32[2,1,16], index: 11, kind: output, shape index: {1}]  }
   0x1   :  { %18 = vsyncpa [#allocation6], 0  ;;  %s1609_s17 = smov 0   ;;  %s1611_s18 = smov 0  }
   0x2   :  { %s1613_s19 = smov 0  }
   0x3 LB: > { %s1625_s20 = sadd.s32 4294967295, %s1541_s19   ;;  %s1628_s21 = sadd.s32 1, %s1541_s19   ;;  %s1541_s19 = sphi %s1613_s19, %s2189_s19   ;;  %s1537_s18 = sphi %s1611_s18, %s2188_s18   ;;  %s1533_s17 = sphi %s1609_s17, %s2187_s17  }
   0x4   : > { %s28_s22 = ssub.s32 %s1541_s19, %s1628_s21  ;;  %s31_s23 = sadd.s32 1, %s1537_s18 }
   0x5   : > { %p29_p0 = scmp.eq.s32.totalorder %s28_s22, 0  ;;  %p38_p1 = scmp.ne.s32.totalorder %s1537_s18, %s1533_s17 }
   0x6   : > { %p39_p2 = scmp.eq.s32.totalorder %s1541_s19, 0  ;;  %p1377_p3 = scmp.ge.s32.totalorder %s1541_s19, 1 }
   0x7   : > { %s1638_s24 = scalar_select %p29_p0, %s1537_s18, %s31_s23  }
   0x8   : > { %p1640_p4 = por %p39_p2, %p38_p1  ;;  %p296_p5 = scmp.lt.s32.totalorder %s1541_s19, 3 }
   0x9   : > { %p1444_p6 = scmp.eq.s32.totalorder %s1625_s20, 0  ;;  %s308_s29 = sshll.u32 %s2170_s1, 4  ;;  %s309_s29 = int_to_ptr.vmem [resolvable:$true] %s308_s29 }
   0xa   : > { %p1646_p7 = pnand %p1377_p3, %p296_p5  ;;  %s318_s13 = sshll.u32 %s2171_s2, 4  ;;  %s319_s13 = int_to_ptr.vmem [resolvable:$true] %s318_s13 }
   0xb   : > { %s1543_s14 = smov [#allocation3]   ;;  %s1544_s15 = smov [#allocation5]  }
   0xc   : > { %p1437_p8 = pneg %p1646_p7  ;;  %p1380_p10 = scmp.ge.s32.totalorder %s1541_s19, 2 }
   0xe   : > { %p1438_p9 = pnand %p1444_p6, %p1437_p8  ;;  %346 = sbr.rel (%p1380_p10) target bundleno = 27 (0x1b), region = 52 }
  0x10   : > { %1440 = dma.vmem_to_smem (!%p1438_p9), %s309_s29, 16, %s1543_s14, [#allocation4]  }
  0x11   : > { %1443 = dma.vmem_to_smem (!%p1438_p9), %s319_s13, 16, %s1544_s15, [#allocation6]  }
  0x13   : > { %349 = sbr.rel (!%p1640_p4) target bundleno = 27 (0x1b), region = 56  ;;  %s351_s16 = sand.u32 (%p1640_p4), 1, %s1537_s18  }
  0x14   : > { %s1382_s22 = sshll.u32 (%p1640_p4), %s1541_s19, 3  ;;  %s1381_s23 = sshll.u32 (%p1640_p4), %s351_s16, 5 }
  0x15   : > { %s355_s30 = scalar_lea.vmem (%p1640_p4), %s2169_s0, %s1382_s22  ;;  %s353_s29 = scalar_lea.vmem (%p1640_p4), [#allocation2], %s1381_s23 }
  0x16   : > { %v390_v0 = vld [vmem:[%s355_s30] sm:$0xff] (%p1640_p4)  ;;  %v392_v1 = vld [vmem:[%s355_s30 + $0x10] sm:$0xff] (%p1640_p4) }
  0x17   : > { %v394_v2 = vld [vmem:[%s355_s30 + $0x20] sm:$0xff] (%p1640_p4)  ;;  %391 = vst [vmem:[%s353_s29] sm:$0xff] (%p1640_p4), %v390_v0  ;;  %v396_v3 = vld [vmem:[%s355_s30 + $0x30] sm:$0xff] (%p1640_p4) }
  0x18   : > { %393 = vst [vmem:[%s353_s29 + $0x8] sm:$0xff] %v392_v1 }
  0x19   : > { %395 = vst [vmem:[%s353_s29 + $0x10] sm:$0xff] %v394_v2 }
  0x1a   : > { %397 = vst [vmem:[%s353_s29 + $0x18] sm:$0xff] %v396_v3 }
  0x1b PF: > { %406 = sbr.rel (%p1646_p7) target bundleno = 1936 (0x790), region = 94  ;;  %s409_s19 = sand.u32 (!%p1646_p7), 1, %s1533_s17  }
  0x1c   : > { %s1384_s25 = sshll.u32 (!%p1646_p7), %s409_s19, 5 }
  0x1d   : > { %s1671_s12 = scalar_lea.vmem (!%p1646_p7), [#allocation2], %s1384_s25 }
  0x20   : > { %1524 = dma.done.wait (%p1444_p6), [#allocation4], 16  }
  0x21   : > { %1526 = vsyncadd (%p1444_p6), [#allocation4], 4294967280 }
  0x22   : > { %1528 = dma.done.wait (%p1444_p6), [#allocation6], 16  }
  0x23   : > { %1530 = vsyncadd (%p1444_p6), [#allocation6], 4294967280 }
  0x24   : > { %425 = sfence }
  0x25   : > { %s1393_s26 = sld [smem:[#allocation3 + $0x3]]  ;;  %v1545_v4 = vmov 0.0   ;;  %s1546_s17 = smov 127   ;;  %v1683_v5 = vld [vmem:[%s1671_s12] sm:$0xff]  ;;  %v1686_v6 = vld [vmem:[%s1671_s12 + $0x8] sm:$0xff]  ;;  %v1689_v7 = vld [vmem:[%s1671_s12 + $0x10] sm:$0xff]  ;;  %v475_v26 = vlaneseq }
  0x26   : > { %551 = vrot.lane.b32.xlu1 %v1545_v4, %s1546_s17  ;;  %s1394_s13 = sld [smem:[#allocation3 + $0x4]]  ;;  %s1547_s16 = smov 1   ;;  %vm1003_vm7 = vcmask 1040384   ;;  %vm1005_vm8 = vcmask 1041408   ;;  %vm1007_vm9 = vcmask 1042432   ;;  %vm1009_vm10 = vcmask 1043456  }
  0x27   : > { %s1395_s14 = sld [smem:[#allocation3 + $0x5]]  ;;  %v1700_v29 = vshrl.u32 %v475_v26, 7  ;;  %v478_v47 = vand.u32 127, %v475_v26  ;;  %vm1011_vm12 = vcmask 1044480   ;;  %vm1013_vm13 = vcmask 1045504   ;;  %p461_p11 = scmp.lt.s32.totalorder %s1625_s20, 1 }
  0x28   : > { %s1396_s15 = sld [smem:[#allocation5 + $0x1]]  ;;  %vm1015_vm14 = vcmask 1046528   ;;  %vm1267_vm15 = vcmask 130055  }
  0x29   : > { %s1397_s22 = sld [smem:[#allocation3 + $0x6]]  ;;  %vm525_vm0 = vcmp.lt.s32.totalorder %v1700_v29, 7  ;;  %vm530_vm1 = vcmp.ge.s32.totalorder %v1700_v29, 1  ;;  %v479_v50 = vand.u32 7, %v478_v47  ;;  %s2191_s20 = smov (!%p461_p11, %s1625_s20), 1 }
  0x2a   : > { %s1398_s23 = sld [smem:[#allocation3 + $0x7]] }
  0x2b   : > { %v496_v8 = vstv %s1393_s26  ;;  %s1399_s27 = sld [smem:[#allocation3 + $0x8]]  ;;  %vm1723_vm2 = vcmp.lt.s32.totalorder %v479_v50, 7  ;;  %vm1727_vm3 = vcmp.ge.s32.totalorder %v479_v50, 1 }
  0x2c   : > { %v497_v9 = vmul.f32 %v496_v8, %v1683_v5  ;;  %v499_v10 = vstv %s1394_s13  ;;  %s1400_s28 = sld [smem:[#allocation5 + $0x2]]  ;;  %vm748_vm4 = vmand %vm530_vm1, %vm1727_vm3 }
  0x2d   : > { %v500_v11 = vmul.f32 %v1686_v6, %v499_v10  ;;  %v503_v12 = vstv %s1395_s14  ;;  %s480_s30 = sld [smem:[#allocation3]]  ;;  %vm727_vm5 = vmand %vm525_vm0, %vm1723_vm2 }
  0x2e   : > { %555 = vrot.lane.b32.xlu1 %v1545_v4, %s1547_s16  ;;  %v504_v13 = vmul.f32 %v1689_v7, %v503_v12  ;;  %v507_v15 = vstv %s1396_s15  ;;  %s1391_s29 = sld [smem:[#allocation3 + $0x1]]  ;;  %vm732_vm6 = vmand %vm525_vm0, %vm1727_vm3 }
  0x2f   : > { %v501_v14 = vadd.f32 %v500_v11, %v497_v9  ;;  %v511_v19 = vstv %s1397_s22  ;;  %s1392_s19 = sld [smem:[#allocation3 + $0x2]]  ;;  %vm743_vm11 = vmand %vm530_vm1, %vm1723_vm2 }
  0x30   : > { %v514_v20 = vstv %s1398_s23  ;;  %v512_v21 = vmul.f32 %v511_v19, %v1683_v5  ;;  %s491_s25 = sld [smem:[#allocation5]]  ;;  %s467_s23 = scalar_lea.vmem %s2180_s11, %s2191_s20 }
  0x31   : > { %v505_v16 = vadd.f32 %v504_v13, %v501_v14  ;;  %v515_v22 = vmul.f32 %v1686_v6, %v514_v20  ;;  %v518_v23 = vstv %s1399_s27 }
  0x32   : > { %v519_v25 = vmul.f32 %v1689_v7, %v518_v23  ;;  %v522_v28 = vstv %s1400_s28 }
  0x33   : > { %v508_v17 = vadd.f32 %v507_v15, %v505_v16  ;;  %v516_v24 = vadd.f32 %v515_v22, %v512_v21  ;;  %v481_v38 = vstv %s480_s30  ;;  %s1387_s30 = sshll.u32 %s2191_s20, 3 }
  0x34   : > { %v484_v39 = vstv %s1391_s29  ;;  %v482_v41 = vmul.f32 %v481_v38, %v1683_v5 }
  0x35   : > { %v509_v18 = vmax.f32 %v508_v17, 0.0  ;;  %v520_v27 = vadd.f32 %v519_v25, %v516_v24  ;;  %v485_v40 = vmul.f32 %v1686_v6, %v484_v39  ;;  %v488_v42 = vstv %s1392_s19 }
  0x36   : > { %v489_v44 = vmul.f32 %v1689_v7, %v488_v42  ;;  %v492_v46 = vstv %s491_s25  ;;  %s464_s25 = scalar_lea.vmem %s2179_s10, %s1387_s30 }
  0x37   : > { %537 = vrot.lane.b32.xlu0 %v509_v18, %s1546_s17  ;;  %v523_v30 = vadd.f32 %v522_v28, %v520_v27  ;;  %v527_v31 = vrot.slane %v509_v18, 1  ;;  %v532_v32 = vrot.slane %v509_v18, 7  ;;  %v486_v43 = vadd.f32 %v485_v40, %v482_v41 }
  0x39   : > { %v524_v33 = vmax.f32 %v523_v30, 0.0  ;;  %v528_v34 = vsel %vm525_vm0, %v527_v31, 0.0  ;;  %v533_v35 = vsel %vm530_vm1, %v532_v32, 0.0  ;;  %v490_v45 = vadd.f32 %v489_v44, %v486_v43 }
  0x3b   : > { %v1708_v36 = vsub.f32 %v528_v34, %v524_v33  ;;  %v1710_v37 = vsub.f32 %v533_v35, %v524_v33  ;;  %v493_v48 = vadd.f32 %v492_v46, %v490_v45 }
  0x3d   : > { %v494_v51 = vmax.f32 %v493_v48, 0.0 }
  0x3f   : > { %543 = vrot.lane.b32.xlu0 %v509_v18, %s1547_s16  ;;  %v1717_v53 = vsel %vm525_vm0, %v494_v51, 0.0  ;;  %v1721_v54 = vsel %vm530_vm1, %v494_v51, 0.0  ;;  %v1735_v59 = vsel %vm1723_vm2, %v494_v51, 0.0  ;;  %v1741_v61 = vsel %vm1727_vm3, %v494_v51, 0.0 }
  0x40   : > { %v547_v57 = vmul.f32 0.0, %v1717_v53  ;;  %v549_v58 = vmul.f32 0.0, %v1721_v54 }
  0x42   : > { %v548_v63 = vadd.f32 %v547_v57, %v1708_v36  ;;  %v550_v3 = vadd.f32 %v549_v58, %v1710_v37 }
  0x44   : > { %v559_v12 = vmax.f32 %v548_v63, %v550_v3 }
  0x98   : > { %v552_v49 = vpop.permute.xlu1 %551 }
  0x99   : > { %v553_v1 = vmul.f32 %v552_v49, %v1735_v59 }
  0xa0   : > { %v556_v62 = vpop.permute.xlu1 %555 }
  0xa1   : > { %v557_v4 = vmul.f32 %v556_v62, %v1741_v61 }
  0xa9   : > { %v538_v52 = vpop.permute.xlu0 %537 }
  0xaa   : > { %v539_v60 = vsel %vm1723_vm2, %v538_v52, 0.0 }
  0xab   : > { %v1744_v0 = vsub.f32 %v539_v60, %v524_v33 }
  0xad   : > { %v554_v10 = vadd.f32 %v553_v1, %v1744_v0 }
  0xb1   : > { %v544_v2 = vpop.permute.xlu0 %543 }
  0xb2   : > { %v545_v8 = vsel %vm1727_vm3, %v544_v2, 0.0 }
  0xb3   : > { %v1751_v9 = vsub.f32 %v545_v8, %v524_v33 }
  0xb5   : > { %v558_v11 = vadd.f32 %v557_v4, %v1751_v9 }
  0xb7   : > { %v560_v13 = vmax.f32 %v554_v10, %v558_v11 }
  0xb9   : > { %v561_v14 = vmax.f32 %v559_v12, %v560_v13 }
  0xbb   : > { %568 = vrot.lane.b32.xlu2 %v561_v14, %s1546_s17  ;;  %v562_v16 = vrot.slane %v561_v14, 1  ;;  %v565_v17 = vrot.slane %v561_v14, 7 }
  0xbd   : > { %v563_v18 = vmul.f32 %v562_v16, %v1717_v53  ;;  %v566_v19 = vmul.f32 %v565_v17, %v1721_v54 }
  0xbf   : > { %v564_v22 = vadd.f32 %v563_v18, %v1708_v36  ;;  %v567_v23 = vadd.f32 %v566_v19, %v1710_v37 }
  0xc1   : > { %v576_v27 = vmax.f32 %v564_v22, %v567_v23 }
  0xc3   : > { %572 = vrot.lane.b32.xlu2 %v561_v14, %s1547_s16 }
 0x115   : > { %v569_v15 = vpop.permute.xlu2 %568 }
 0x116   : > { %v570_v20 = vmul.f32 %v569_v15, %v1735_v59 }
 0x118   : > { %v571_v25 = vadd.f32 %v570_v20, %v1744_v0 }
 0x11d   : > { %v573_v21 = vpop.permute.xlu2 %572 }
 0x11e   : > { %v574_v24 = vmul.f32 %v573_v21, %v1741_v61 }
 0x120   : > { %v575_v26 = vadd.f32 %v574_v24, %v1751_v9 }
 0x122   : > { %v577_v28 = vmax.f32 %v571_v25, %v575_v26 }
 0x124   : > { %v578_v30 = vmax.f32 %v576_v27, %v577_v28 }
 0x126   : > { %v579_v31 = vmax.f32 %v578_v30, %v561_v14 }
 0x128   : > { %590 = vrot.lane.b32.xlu1 %v579_v31, %s1547_s16  ;;  %586 = vrot.lane.b32.xlu0 %v579_v31, %s1546_s17  ;;  %v580_v32 = vrot.slane %v579_v31, 1  ;;  %v583_v33 = vrot.slane %v579_v31, 7 }
 0x12a   : > { %v581_v34 = vmul.f32 %v580_v32, %v1717_v53  ;;  %v584_v35 = vmul.f32 %v583_v33, %v1721_v54 }
 0x12c   : > { %v582_v41 = vadd.f32 %v581_v34, %v1708_v36  ;;  %v585_v42 = vadd.f32 %v584_v35, %v1710_v37 }
 0x12e   : > { %v594_v46 = vmax.f32 %v582_v41, %v585_v42 }
 0x19a   : > { %v591_v38 = vpop.permute.xlu1 %590  ;;  %v587_v39 = vpop.permute.xlu0 %586 }
 0x19b   : > { %v592_v40 = vmul.f32 %v591_v38, %v1741_v61  ;;  %v588_v43 = vmul.f32 %v587_v39, %v1735_v59 }
 0x19d   : > { %v593_v44 = vadd.f32 %v592_v40, %v1751_v9  ;;  %v589_v45 = vadd.f32 %v588_v43, %v1744_v0 }
 0x19f   : > { %v595_v47 = vmax.f32 %v589_v45, %v593_v44 }
 0x1a1   : > { %v596_v48 = vmax.f32 %v594_v46, %v595_v47 }
 0x1a3   : > { %v597_v49 = vmax.f32 %v596_v48, %v579_v31 }
 0x1a5   : > { %608 = vrot.lane.b32.xlu0 %v597_v49, %s1547_s16  ;;  %604 = vrot.lane.b32.xlu2 %v597_v49, %s1546_s17  ;;  %v598_v50 = vrot.slane %v597_v49, 1  ;;  %v601_v51 = vrot.slane %v597_v49, 7 }
 0x1a7   : > { %v599_v57 = vmul.f32 %v598_v50, %v1717_v53  ;;  %v602_v58 = vmul.f32 %v601_v51, %v1721_v54 }
 0x1a9   : > { %v600_v63 = vadd.f32 %v599_v57, %v1708_v36  ;;  %v603_v1 = vadd.f32 %v602_v58, %v1710_v37 }
 0x1ab   : > { %v612_v8 = vmax.f32 %v600_v63, %v603_v1 }
 0x1ff   : > { %v605_v52 = vpop.permute.xlu2 %604 }
 0x200   : > { %v606_v60 = vmul.f32 %v605_v52, %v1735_v59 }
 0x202   : > { %v607_v3 = vadd.f32 %v606_v60, %v1744_v0 }
 0x217   : > { %v609_v62 = vpop.permute.xlu0 %608 }
 0x218   : > { %v610_v2 = vmul.f32 %v609_v62, %v1741_v61 }
 0x21a   : > { %v611_v4 = vadd.f32 %v610_v2, %v1751_v9 }
 0x21c   : > { %v613_v10 = vmax.f32 %v607_v3, %v611_v4 }
 0x21e   : > { %v614_v11 = vmax.f32 %v612_v8, %v613_v10 }
 0x220   : > { %v615_v12 = vmax.f32 %v614_v11, %v597_v49 }
 0x222   : > { %626 = vrot.lane.b32.xlu2 %v615_v12, %s1547_s16  ;;  %622 = vrot.lane.b32.xlu1 %v615_v12, %s1546_s17  ;;  %v616_v13 = vrot.slane %v615_v12, 1  ;;  %v619_v14 = vrot.slane %v615_v12, 7 }
 0x224   : > { %v617_v16 = vmul.f32 %v616_v13, %v1717_v53  ;;  %v620_v17 = vmul.f32 %v619_v14, %v1721_v54 }
 0x226   : > { %v618_v20 = vadd.f32 %v617_v16, %v1708_v36  ;;  %v621_v21 = vadd.f32 %v620_v17, %v1710_v37 }
 0x228   : > { %v630_v25 = vmax.f32 %v618_v20, %v621_v21 }
 0x27c   : > { %v627_v15 = vpop.permute.xlu2 %626 }
 0x27d   : > { %v628_v18 = vmul.f32 %v627_v15, %v1741_v61 }
 0x27f   : > { %v629_v23 = vadd.f32 %v628_v18, %v1751_v9 }
 0x294   : > { %v623_v19 = vpop.permute.xlu1 %622 }
 0x295   : > { %v624_v22 = vmul.f32 %v623_v19, %v1735_v59 }
 0x297   : > { %v625_v24 = vadd.f32 %v624_v22, %v1744_v0 }
 0x299   : > { %v631_v26 = vmax.f32 %v625_v24, %v629_v23 }
 0x29b   : > { %v632_v27 = vmax.f32 %v630_v25, %v631_v26 }
 0x29d   : > { %v633_v28 = vmax.f32 %v632_v27, %v615_v12  ;;  %v1828_v27 = vld [vmem:[%s1671_s12 + $0x18] sm:$0xff] }
 0x29f   : > { %644 = vrot.lane.b32.xlu1 %v633_v28, %s1547_s16  ;;  %640 = vrot.lane.b32.xlu0 %v633_v28, %s1546_s17  ;;  %v634_v30 = vrot.slane %v633_v28, 1  ;;  %v637_v31 = vrot.slane %v633_v28, 7 }
 0x2a1   : > { %v635_v32 = vmul.f32 %v634_v30, %v1717_v53  ;;  %v638_v33 = vmul.f32 %v637_v31, %v1721_v54  ;;  %v1833_v30 = vsub.f32 1.0, %v1683_v5 }
 0x2a3   : > { %v636_v39 = vadd.f32 %v635_v32, %v1708_v36  ;;  %v639_v40 = vadd.f32 %v638_v33, %v1710_v37  ;;  %v740_v33 = vrot.slane %v1828_v27, 7 }
 0x2a5   : > { %v648_v44 = vmax.f32 %v636_v39, %v639_v40 }
 0x311   : > { %v645_v34 = vpop.permute.xlu1 %644  ;;  %v641_v35 = vpop.permute.xlu0 %640 }
 0x312   : > { %v646_v38 = vmul.f32 %v645_v34, %v1741_v61  ;;  %v642_v41 = vmul.f32 %v641_v35, %v1735_v59 }
 0x314   : > { %v647_v42 = vadd.f32 %v646_v38, %v1751_v9  ;;  %v643_v43 = vadd.f32 %v642_v41, %v1744_v0 }
 0x316   : > { %v649_v45 = vmax.f32 %v643_v43, %v647_v42 }
 0x318   : > { %v650_v46 = vmax.f32 %v648_v44, %v649_v45 }
 0x31a   : > { %v651_v47 = vmax.f32 %v650_v46, %v633_v28  ;;  %v724_v28 = vrot.slane %v1828_v27, 1 }
 0x31c   : > { %662 = vrot.lane.b32.xlu0 %v651_v47, %s1547_s16  ;;  %658 = vrot.lane.b32.xlu2 %v651_v47, %s1546_s17  ;;  %v652_v48 = vrot.slane %v651_v47, 1  ;;  %v655_v49 = vrot.slane %v651_v47, 7  ;;  %v1837_v31 = vsel %vm525_vm0, %v724_v28, 0.0  ;;  %vm1120_vm0 = vcmask 293888  }
 0x31d   : > { %v758_v32 = vmul.f32 %v1833_v30, %v1837_v31 }
 0x31e   : > { %v653_v51 = vmul.f32 %v652_v48, %v1717_v53  ;;  %v656_v52 = vmul.f32 %v655_v49, %v1721_v54 }
 0x320   : > { %v654_v60 = vadd.f32 %v653_v51, %v1708_v36  ;;  %v657_v62 = vadd.f32 %v656_v52, %v1710_v37  ;;  %v1056_v51 = vld [vmem:[%s2172_s3 + $0x78] sm:$0xff]  ;;  %v1055_v52 = vld [vmem:[%s2172_s3 + $0x70] sm:$0xff] }
 0x321   : > { %1413 = vmatpush.msra.mxu3 %v1056_v51  ;;  %1057 = vmatpush.msra.mxu0 %v1056_v51  ;;  %v1053_v51 = vld [vmem:[%s2172_s3 + $0x60] sm:$0xff] }
 0x322   : > { %v666_v3 = vmax.f32 %v654_v60, %v657_v62  ;;  %v1880_v62 = vsel %vm530_vm1, %v740_v33, 0.0  ;;  %vm1193_vm1 = vcmask 261120  }
 0x323   : > { %1414 = vmatpush.msra.mxu3 %v1055_v52  ;;  %1058 = vmatpush.msra.mxu0 %v1055_v52 }
 0x376   : > { %v659_v50 = vpop.permute.xlu2 %658 }
 0x377   : > { %v660_v57 = vmul.f32 %v659_v50, %v1735_v59 }
 0x379   : > { %v661_v1 = vadd.f32 %v660_v57, %v1744_v0  ;;  %v1054_v57 = vld [vmem:[%s2172_s3 + $0x68] sm:$0xff] }
 0x37a   : > { %1415 = vmatpush.msra.mxu3 %v1054_v57  ;;  %1059 = vmatpush.msra.mxu0 %v1054_v57 }
 0x37c   : > { %1416 = vmatpush.msra.mxu3 %v1053_v51  ;;  %1060 = vmatpush.msra.mxu0 %v1053_v51 }
 0x38e   : > { %v663_v58 = vpop.permute.xlu0 %662 }
 0x38f   : > { %v664_v63 = vmul.f32 %v663_v58, %v1741_v61 }
 0x391   : > { %v665_v2 = vadd.f32 %v664_v63, %v1751_v9 }
 0x393   : > { %v667_v4 = vmax.f32 %v661_v1, %v665_v2  ;;  %v863_v1 = vmul.f32 %v1686_v6, %v1880_v62 }
 0x395   : > { %v668_v8 = vmax.f32 %v666_v3, %v667_v4 }
 0x397   : > { %v669_v10 = vmax.f32 %v668_v8, %v651_v47 }
 0x399   : > { %680 = vrot.lane.b32.xlu2 %v669_v10, %s1547_s16  ;;  %676 = vrot.lane.b32.xlu1 %v669_v10, %s1546_s17  ;;  %v670_v11 = vrot.slane %v669_v10, 1  ;;  %v673_v12 = vrot.slane %v669_v10, 7 }
 0x39b   : > { %v671_v14 = vmul.f32 %v670_v11, %v1717_v53  ;;  %v674_v15 = vmul.f32 %v673_v12, %v1721_v54  ;;  %v884_v12 = vmul.f32 %v1689_v7, %v1837_v31 }
 0x39d   : > { %v672_v18 = vadd.f32 %v671_v14, %v1708_v36  ;;  %v675_v19 = vadd.f32 %v674_v15, %v1710_v37  ;;  %v759_v15 = vrot.slane %v758_v32, 4 }
 0x39f   : > { %v684_v23 = vmax.f32 %v672_v18, %v675_v19 }
 0x3a1   : > { %746 = vrot.lane.b32.xlu2 %v740_v33, %s1547_s16 }
 0x3a9   : > { %725 = vrot.lane.b32.xlu2 %v724_v28, %s1546_s17 }
 0x3b1   : > { %737 = vrot.lane.b32.xlu2 %v1828_v27, %s1547_s16 }
 0x3f3   : > { %v681_v13 = vpop.permute.xlu2 %680 }
 0x3f4   : > { %v682_v16 = vmul.f32 %v681_v13, %v1741_v61 }
 0x3f6   : > { %v683_v21 = vadd.f32 %v682_v16, %v1751_v9 }
 0x3fb   : > { %v747_v58 = vpop.permute.xlu2 %746 }
 0x3fc   : > { %v1876_v60 = vsel %vm748_vm4, %v747_v58, 0.0 }
 0x3fd   : > { %v870_v63 = vmul.f32 %v1686_v6, %v1876_v60  ;;  %v807_v19 = vmul.f32 %v1833_v30, %v1876_v60 }
 0x3ff   : > { %v871_v3 = vrot.slane %v870_v63, 4 }
 0x401   : > { %v872_v16 = vadd.f32 %v871_v3, %v870_v63 }
 0x403   : > { %v726_v2 = vpop.permute.xlu2 %725 }
 0x404   : > { %v1890_v4 = vsel %vm727_vm5, %v726_v2, 0.0  ;;  %v1052_v2 = vld [vmem:[%s2172_s3 + $0x58] sm:$0xff] }
 0x405   : > { %v751_v8 = vmul.f32 %v1833_v30, %v1890_v4  ;;  %v877_v11 = vmul.f32 %v1689_v7, %v1890_v4  ;;  %1417 = vmatpush.msra.mxu3 %v1052_v2  ;;  %1061 = vmatpush.msra.mxu0 %v1052_v2 }
 0x407   : > { %v752_v13 = vrot.slane %v751_v8, 4 }
 0x40b   : > { %v677_v17 = vpop.permute.xlu1 %676 }
 0x40c   : > { %v678_v20 = vmul.f32 %v677_v17, %v1735_v59  ;;  %v878_v17 = vrot.slane %v877_v11, 4 }
 0x40e   : > { %v679_v22 = vadd.f32 %v678_v20, %v1744_v0  ;;  %v814_v20 = vmul.f32 %v1686_v6, %v1890_v4 }
 0x410   : > { %v685_v24 = vmax.f32 %v679_v22, %v683_v21  ;;  %v753_v22 = vadd.f32 %v752_v13, %v751_v8  ;;  %v1051_v13 = vld [vmem:[%s2172_s3 + $0x50] sm:$0xff] }
 0x411   : > { %1418 = vmatpush.msra.mxu3 %v1051_v13  ;;  %1062 = vmatpush.msra.mxu0 %v1051_v13 }
 0x412   : > { %v686_v25 = vmax.f32 %v684_v23, %v685_v24  ;;  %v879_v23 = vadd.f32 %v878_v17, %v877_v11 }
 0x414   : > { %v687_v26 = vmax.f32 %v686_v25, %v669_v10  ;;  %v864_v10 = vrot.slane %v863_v1, 4  ;;  %v760_v25 = vadd.f32 %v759_v15, %v758_v32 }
 0x416   : > { %698 = vrot.lane.b32.xlu1 %v687_v26, %s1547_s16  ;;  %694 = vrot.lane.b32.xlu0 %v687_v26, %s1546_s17  ;;  %v688_v34 = vrot.slane %v687_v26, 1  ;;  %v691_v35 = vrot.slane %v687_v26, 7  ;;  %v865_v21 = vadd.f32 %v864_v10, %v863_v1 }
 0x418   : > { %v689_v38 = vmul.f32 %v688_v34, %v1717_v53  ;;  %v692_v5 = vmul.f32 %v691_v35, %v1721_v54  ;;  %v808_v34 = vrot.slane %v807_v19, 4  ;;  %v815_v35 = vrot.slane %v814_v20, 4 }
 0x41a   : > { %v690_v42 = vadd.f32 %v689_v38, %v1708_v36  ;;  %v693_v43 = vadd.f32 %v692_v5, %v1710_v37  ;;  %v866_v38 = vrot.slane %v865_v21, 2  ;;  %v754_v5 = vrot.slane %v753_v22, 2 }
 0x41c   : > { %v702_v47 = vmax.f32 %v690_v42, %v693_v43  ;;  %v761_v42 = vrot.slane %v760_v25, 2  ;;  %v755_v32 = vadd.f32 %v754_v5, %v753_v22 }
 0x41e   : > { %730 = vrot.lane.b32.xlu0 %v724_v28, %s1547_s16  ;;  %v873_v28 = vrot.slane %v872_v16, 2  ;;  %v762_v58 = vadd.f32 %v761_v42, %v760_v25  ;;  %v756_v11 = vrot.slane %v755_v32, 1 }
 0x420   : > { %v757_v25 = vadd.f32 %v756_v11, %v755_v32 }
 0x488   : > { %v699_v39 = vpop.permute.xlu1 %698  ;;  %v695_v40 = vpop.permute.xlu0 %694 }
 0x489   : > { %v700_v41 = vmul.f32 %v699_v39, %v1741_v61  ;;  %v696_v44 = vmul.f32 %v695_v40, %v1735_v59  ;;  %v880_v39 = vrot.slane %v879_v23, 2 }
 0x48b   : > { %v701_v45 = vadd.f32 %v700_v41, %v1751_v9  ;;  %v697_v46 = vadd.f32 %v696_v44, %v1744_v0  ;;  %v821_v41 = vmul.f32 %v1686_v6, %v1837_v31  ;;  %v874_v44 = vadd.f32 %v873_v28, %v872_v16  ;;  %v738_v28 = vpop.permute.xlu2 %737 }
 0x48c   : > { %v763_v16 = vrot.slane %v762_v58, 1 }
 0x48d   : > { %v703_v48 = vmax.f32 %v697_v46, %v701_v45  ;;  %v809_v46 = vadd.f32 %v808_v34, %v807_v19  ;;  %v822_v52 = vrot.slane %v821_v41, 4  ;;  %v875_v1 = vrot.slane %v874_v44, 1  ;;  %v1050_v19 = vld [vmem:[%s2172_s3 + $0x48] sm:$0xff] }
 0x48e   : > { %1419 = vmatpush.msra.mxu3 %v1050_v19  ;;  %1063 = vmatpush.msra.mxu0 %v1050_v19 }
 0x48f   : > { %v704_v49 = vmax.f32 %v702_v47, %v703_v48  ;;  %v816_v47 = vadd.f32 %v815_v35, %v814_v20  ;;  %v867_v48 = vadd.f32 %v866_v38, %v865_v21  ;;  %v810_v3 = vrot.slane %v809_v46, 2 }
 0x490   : > { %v731_v14 = vpop.permute.xlu0 %730  ;;  %v876_v17 = vadd.f32 %v875_v1, %v874_v44  ;;  %v926_v21 = vmul.f32 %v1689_v7, %v1880_v62  ;;  %v1935_v44 = vsel %vm1727_vm3, %v738_v28, 0.0 }
 0x491   : > { %v1854_v50 = vmax.f32 %v704_v49, %v687_v26  ;;  %v1902_v18 = vsel %vm732_vm6, %v731_v14, 0.0  ;;  %v885_v26 = vrot.slane %v884_v12, 4  ;;  %v881_v49 = vadd.f32 %v880_v39, %v879_v23 }
 0x492   : > { %v765_v24 = vmul.f32 %v1833_v30, %v1902_v18  ;;  %v817_v8 = vrot.slane %v816_v47, 2  ;;  %v868_v10 = vrot.slane %v867_v48, 1  ;;  %v823_v14 = vadd.f32 %v822_v52, %v821_v41 }
 0x493   : > { %716 = vrot.lane.b32.xlu1 %v1854_v50, %s1547_s16  ;;  %712 = vrot.lane.b32.xlu0 %v1854_v50, %s1546_s17  ;;  %v886_v43 = vadd.f32 %v885_v26, %v884_v12  ;;  %v882_v12 = vrot.slane %v881_v49, 1  ;;  %v811_v22 = vadd.f32 %v810_v3, %v809_v46  ;;  %v891_v5 = vmul.f32 %v1689_v7, %v1902_v18 }
 0x494   : > { %v818_v23 = vadd.f32 %v817_v8, %v816_v47  ;;  %v824_v35 = vrot.slane %v823_v14, 2  ;;  %v764_v41 = vadd.f32 %v763_v16, %v762_v58  ;;  %v786_v56 = vmul.f32 %v1833_v30, %v1935_v44  ;;  %v1049_v8 = vld [vmem:[%s2172_s3 + $0x40] sm:$0xff] }
 0x495   : > { %v887_v63 = vrot.slane %v886_v43, 2  ;;  %v883_v26 = vadd.f32 %v882_v12, %v881_v49  ;;  %v812_v42 = vrot.slane %v811_v22, 1  ;;  %v892_v49 = vrot.slane %v891_v5, 4  ;;  %1420 = vmatpush.msra.mxu3 %v1049_v8  ;;  %1064 = vmatpush.msra.mxu0 %v1049_v8 }
 0x496   : > { %v825_v32 = vadd.f32 %v824_v35, %v823_v14  ;;  %v927_v58 = vrot.slane %v926_v21, 4  ;;  %v787_v12 = vrot.slane %v786_v56, 4  ;;  %v1048_v14 = vld [vmem:[%s2172_s3 + $0x38] sm:$0xff]  ;;  %v779_v16 = vmul.f32 %v1828_v27, %v1833_v30 }
 0x497   : > { %v888_v20 = vadd.f32 %v887_v63, %v886_v43  ;;  %v933_v43 = vmul.f32 %v1689_v7, %v1876_v60  ;;  %v813_v1 = vadd.f32 %v812_v42, %v811_v22  ;;  %1421 = vmatpush.msra.mxu3 %v1048_v14  ;;  %1065 = vmatpush.msra.mxu0 %v1048_v14  ;;  %v706_v35 = vrot.slane %v1854_v50, 1 }
 0x498   : > { %v826_v11 = vrot.slane %v825_v32, 1 }
 0x499   : > { %v889_v34 = vrot.slane %v888_v20, 1  ;;  %v934_v63 = vrot.slane %v933_v43, 4 }
 0x49b   : > { %734 = vrot.lane.b32.xlu1 %v1828_v27, %s1546_s17  ;;  %741 = vrot.lane.b32.xlu0 %v740_v33, %s1546_s17  ;;  %v766_v33 = vrot.slane %v765_v24, 4  ;;  %v890_v39 = vadd.f32 %v889_v34, %v888_v20  ;;  %v935_v19 = vadd.f32 %v934_v63, %v933_v43  ;;  %v827_v20 = vadd.f32 %v826_v11, %v825_v32 }
 0x49d   : > { %v767_v40 = vadd.f32 %v766_v33, %v765_v24  ;;  %v828_v24 = vmul.f32 %v1686_v6, %v1902_v18  ;;  %v869_v33 = vadd.f32 %v868_v10, %v867_v48  ;;  %v1004_v48 = vsel %vm1003_vm7, %v757_v25, %v764_v41 }
 0x49e   : > { %v893_v10 = vadd.f32 %v892_v49, %v891_v5  ;;  %v780_v25 = vrot.slane %v779_v16, 4  ;;  %v788_v5 = vadd.f32 %v787_v12, %v786_v56  ;;  %v707_v56 = vmul.f32 %v706_v35, %v1717_v53  ;;  %v1043_v53 = vld [vmem:[%s2172_s3 + $0x10] sm:$0xff] }
 0x49f   : > { %v768_v45 = vrot.slane %v767_v40, 2  ;;  %v829_v46 = vrot.slane %v828_v24, 4 }
 0x4a0   : > { %v894_v28 = vrot.slane %v893_v10, 2  ;;  %v781_v42 = vadd.f32 %v780_v25, %v779_v16 }
 0x4a1   : > { %v769_v57 = vadd.f32 %v768_v45, %v767_v40  ;;  %v1024_v40 = vsel %vm1003_vm7, %v869_v33, %v876_v17  ;;  %v819_v45 = vrot.slane %v818_v23, 1  ;;  %v830_v3 = vadd.f32 %v829_v46, %v828_v24  ;;  %v1045_v46 = vld [vmem:[%s2172_s3 + $0x20] sm:$0xff] }
 0x4a2   : > { %v1025_v47 = vsel %vm1005_vm8, %v1024_v40, %v883_v26  ;;  %v928_v17 = vadd.f32 %v927_v58, %v926_v21  ;;  %v849_v33 = vmul.f32 %v1686_v6, %v1935_v44  ;;  %v800_v21 = vmul.f32 %v1833_v30, %v1880_v62  ;;  %v1046_v40 = vld [vmem:[%s2172_s3 + $0x28] sm:$0xff] }
 0x4a3   : > { %v770_v15 = vrot.slane %v769_v57, 1  ;;  %v1940_v51 = vsel %vm1007_vm9, %v1025_v47, %v890_v39  ;;  %v820_v2 = vadd.f32 %v819_v45, %v818_v23  ;;  %v831_v22 = vrot.slane %v830_v3, 2  ;;  %v1047_v23 = vld [vmem:[%s2172_s3 + $0x30] sm:$0xff] }
 0x4a4   : > { %1422 = vmatpush.msra.mxu3 %v1047_v23  ;;  %1066 = vmatpush.msra.mxu0 %v1047_v23  ;;  %v801_v43 = vrot.slane %v800_v21, 4  ;;  %v936_v45 = vrot.slane %v935_v19, 2  ;;  %v929_v47 = vrot.slane %v928_v17, 2  ;;  %v895_v32 = vadd.f32 %v894_v28, %v893_v10 }
 0x4a5   : > { %v771_v38 = vadd.f32 %v770_v15, %v769_v57  ;;  %v912_v57 = vmul.f32 %v1689_v7, %v1935_v44  ;;  %v905_v15 = vmul.f32 %v1828_v27, %v1689_v7  ;;  %v1017_v26 = vsel %vm1003_vm7, %v813_v1, %v820_v2  ;;  %v1044_v1 = vld [vmem:[%s2172_s3 + $0x18] sm:$0xff] }
 0x4a6   : > { %v1968_v34 = vsel %vm1005_vm8, %v1017_v26, %v827_v20  ;;  %1423 = vmatpush.msra.mxu3 %v1046_v40  ;;  %1067 = vmatpush.msra.mxu0 %v1046_v40  ;;  %v850_v49 = vrot.slane %v849_v33, 4  ;;  %v789_v58 = vrot.slane %v788_v5, 2  ;;  %v782_v8 = vrot.slane %v781_v42, 2 }
 0x4a7   : > { %v1943_v52 = vsel %vm1005_vm8, %v1004_v48, %v771_v38  ;;  %v913_v13 = vrot.slane %v912_v57, 4  ;;  %v906_v24 = vrot.slane %v905_v15, 4  ;;  %v709_v38 = vrot.slane %v1854_v50, 7 }
 0x4a8   : > { %v832_v48 = vadd.f32 %v831_v22, %v830_v3  ;;  %1424 = vmatpush.msra.mxu3 %v1045_v46  ;;  %1068 = vmatpush.msra.mxu0 %v1045_v46  ;;  %v802_v11 = vadd.f32 %v801_v43, %v800_v21  ;;  %v842_v3 = vmul.f32 %v1828_v27, %v1686_v6 }
 0x4a9   : > { %v914_v39 = vadd.f32 %v913_v13, %v912_v57  ;;  %v907_v41 = vadd.f32 %v906_v24, %v905_v15  ;;  %v710_v57 = vmul.f32 %v709_v38, %v1721_v54  ;;  %v937_v10 = vadd.f32 %v936_v45, %v935_v19  ;;  %v1042_v54 = vld [vmem:[%s2172_s3 + $0x8] sm:$0xff]  ;;  %v1041_v19 = vld [vmem:[%s2172_s3] sm:$0xff] }
 0x4aa   : > { %1425 = vmatpush.msra.mxu3 %v1044_v1  ;;  %1069 = vmatpush.msra.mxu0 %v1044_v1  ;;  %v833_v12 = vrot.slane %v832_v48, 1  ;;  %v896_v13 = vrot.slane %v895_v32, 1  ;;  %v851_v14 = vadd.f32 %v850_v49, %v849_v33  ;;  %v843_v15 = vrot.slane %v842_v3, 4 }
 0x4ab   : > { %v915_v63 = vrot.slane %v914_v39, 2  ;;  %v908_v2 = vrot.slane %v907_v41, 2  ;;  %v930_v16 = vadd.f32 %v929_v47, %v928_v17  ;;  %v708_v20 = vadd.f32 %v707_v56, %v1708_v36 }
 0x4ac   : > { %1426 = vmatpush.msra.mxu3 %v1043_v53  ;;  %1070 = vmatpush.msra.mxu0 %v1043_v53  ;;  %v790_v22 = vadd.f32 %v789_v58, %v788_v5  ;;  %v711_v26 = vadd.f32 %v710_v57, %v1710_v37  ;;  %v783_v33 = vadd.f32 %v782_v8, %v781_v42  ;;  %v803_v21 = vrot.slane %v802_v11, 2 }
 0x4ad   : > { %v916_v23 = vadd.f32 %v915_v63, %v914_v39  ;;  %v909_v28 = vadd.f32 %v908_v2, %v907_v41  ;;  %v938_v35 = vrot.slane %v937_v10, 1  ;;  %v844_v38 = vadd.f32 %v843_v15, %v842_v3 }
 0x4ae   : > { %1427 = vmatpush.msra.mxu3 %v1042_v54  ;;  %1071 = vmatpush.msra.mxu0 %v1042_v54  ;;  %v834_v5 = vadd.f32 %v833_v12, %v832_v48  ;;  %v897_v40 = vadd.f32 %v896_v13, %v895_v32  ;;  %v852_v43 = vrot.slane %v851_v14, 2  ;;  %v791_v45 = vrot.slane %v790_v22, 1 }
 0x4af   : > { %v917_v41 = vrot.slane %v916_v23, 1  ;;  %v931_v42 = vrot.slane %v930_v16, 1  ;;  %v910_v46 = vrot.slane %v909_v28, 1  ;;  %v784_v47 = vrot.slane %v783_v33, 1 }
 0x4b0   : > { %1428 = vmatpush.msra.mxu3 %v1041_v19  ;;  %1072 = vmatpush.msra.mxu0 %v1041_v19  ;;  %v804_v49 = vadd.f32 %v803_v21, %v802_v11  ;;  %v2000_v57 = vadd.f32 %v938_v35, %v937_v10  ;;  %v853_v48 = vadd.f32 %v852_v43, %v851_v14 }
 0x4b1   : > { %v2010_v32 = vadd.f32 %v917_v41, %v916_v23  ;;  %v2012_v58 = vadd.f32 %v791_v45, %v790_v22  ;;  %v2016_v63 = vsel %vm1007_vm9, %v1968_v34, %v834_v5  ;;  %v2018_v8 = vadd.f32 %v910_v46, %v909_v28 }
 0x4b2   : > { %v2020_v11 = vadd.f32 %v784_v47, %v783_v33  ;;  %v805_v29 = vrot.slane %v804_v49, 1  ;;  %v2022_v3 = vadd.f32 %v931_v42, %v930_v16 }
 0x4b4   : > { %v806_v45 = vadd.f32 %v805_v29, %v804_v49 }
 0x505   : > { %v717_v24 = vpop.permute.xlu1 %716  ;;  %v713_v25 = vpop.permute.xlu0 %712 }
 0x506   : > { %v718_v17 = vmul.f32 %v717_v24, %v1741_v61  ;;  %v714_v36 = vmul.f32 %v713_v25, %v1735_v59  ;;  %v720_v61 = vmax.f32 %v708_v20, %v711_v26  ;;  %v845_v59 = vrot.slane %v844_v38, 2 }
 0x508   : > { %v719_v39 = vadd.f32 %v718_v17, %v1751_v9  ;;  %v715_v37 = vadd.f32 %v714_v36, %v1744_v0  ;;  %v2008_v0 = vsel %vm1009_vm10, %v1940_v51, %v897_v40  ;;  %v846_v54 = vadd.f32 %v845_v59, %v844_v38 }
 0x509   : > { %v854_v36 = vrot.slane %v853_v48, 1 }
 0x50a   : > { %v721_v56 = vmax.f32 %v715_v37, %v719_v39 }
 0x50c   : > { %v722_v9 = vmax.f32 %v720_v61, %v721_v56 }
 0x50d   : > { %v735_v1 = vpop.permute.xlu1 %734  ;;  %v742_v2 = vpop.permute.xlu0 %741 }
 0x50e   : > { %v2025_v51 = vmax.f32 %v722_v9, %v1854_v50  ;;  %v736_v10 = vsel %vm1723_vm2, %v735_v1, 0.0  ;;  %v744_v53 = vsel %vm743_vm11, %v742_v2, 0.0  ;;  %v855_v9 = vadd.f32 %v854_v36, %v853_v48 }
 0x50f   : > { %v772_v34 = vmul.f32 %v1833_v30, %v736_v10  ;;  %v835_v12 = vmul.f32 %v1686_v6, %v736_v10  ;;  %v898_v13 = vmul.f32 %v1689_v7, %v736_v10  ;;  %v793_v14 = vmul.f32 %v1833_v30, %v744_v53 }
 0x510   : > { %v975_v15 = vmul.f32 %v1935_v44, %v2025_v51  ;;  %v961_v16 = vmul.f32 %v736_v10, %v2025_v51  ;;  %v856_v50 = vmul.f32 %v1686_v6, %v744_v53  ;;  %v919_v55 = vmul.f32 %v1689_v7, %v744_v53 }
 0x511   : > { %v773_v20 = vrot.slane %v772_v34, 4  ;;  %v836_v22 = vrot.slane %v835_v12, 4  ;;  %v899_v19 = vrot.slane %v898_v13, 4  ;;  %v794_v23 = vrot.slane %v793_v14, 4 }
 0x512   : > { %v976_v24 = vrot.slane %v975_v15, 4  ;;  %v962_v25 = vrot.slane %v961_v16, 4  ;;  %v857_v26 = vrot.slane %v856_v50, 4  ;;  %v920_v28 = vrot.slane %v919_v55, 4 }
 0x513   : > { %v774_v33 = vadd.f32 %v773_v20, %v772_v34  ;;  %v837_v30 = vadd.f32 %v836_v22, %v835_v12  ;;  %v900_v21 = vadd.f32 %v899_v19, %v898_v13  ;;  %v795_v35 = vadd.f32 %v794_v23, %v793_v14 }
 0x514   : > { %v963_v44 = vadd.f32 %v962_v25, %v961_v16  ;;  %v921_v17 = vadd.f32 %v920_v28, %v919_v55  ;;  %v847_v6 = vrot.slane %v846_v54, 1  ;;  %v977_v43 = vadd.f32 %v976_v24, %v975_v15 }
 0x515   : > { %v775_v7 = vrot.slane %v774_v33, 2  ;;  %v838_v38 = vrot.slane %v837_v30, 2  ;;  %v901_v5 = vrot.slane %v900_v21, 2  ;;  %v796_v40 = vrot.slane %v795_v35, 2 }
 0x516   : > { %v858_v39 = vadd.f32 %v857_v26, %v856_v50  ;;  %v922_v37 = vrot.slane %v921_v17, 2  ;;  %v964_v46 = vrot.slane %v963_v44, 2  ;;  %v982_v59 = vmul.f32 %v744_v53, %v2025_v51 }
 0x517   : > { %v776_v41 = vadd.f32 %v775_v7, %v774_v33  ;;  %v902_v42 = vadd.f32 %v901_v5, %v900_v21  ;;  %v797_v47 = vadd.f32 %v796_v40, %v795_v35  ;;  %v839_v61 = vadd.f32 %v838_v38, %v837_v30 }
 0x518   : > { %v923_v56 = vadd.f32 %v922_v37, %v921_v17  ;;  %v848_v34 = vadd.f32 %v847_v6, %v846_v54  ;;  %v978_v12 = vrot.slane %v977_v43, 2  ;;  %v983_v14 = vrot.slane %v982_v59, 4 }
 0x519   : > { %v777_v1 = vrot.slane %v776_v41, 1  ;;  %v903_v2 = vrot.slane %v902_v42, 1  ;;  %v798_v10 = vrot.slane %v797_v47, 1  ;;  %v940_v15 = vmul.f32 %v1890_v4, %v2025_v51 }
 0x51a   : > { %v924_v13 = vrot.slane %v923_v56, 1  ;;  %v2041_v29 = vadd.f32 %v964_v46, %v963_v44  ;;  %v859_v16 = vrot.slane %v858_v39, 2  ;;  %v840_v55 = vrot.slane %v839_v61, 1 }
 0x51b   : > { %v778_v49 = vadd.f32 %v777_v1, %v776_v41  ;;  %v904_v50 = vadd.f32 %v903_v2, %v902_v42  ;;  %v799_v20 = vadd.f32 %v798_v10, %v797_v47  ;;  %v941_v22 = vrot.slane %v940_v15, 4 }
 0x51c   : > { %v947_v48 = vmul.f32 %v1837_v31, %v2025_v51  ;;  %v925_v53 = vadd.f32 %v924_v13, %v923_v56  ;;  %v954_v4 = vmul.f32 %v1902_v18, %v2025_v51  ;;  %v984_v23 = vadd.f32 %v983_v14, %v982_v59 }
 0x51d   : > { %v1028_v54 = vsel %vm1011_vm12, %v2008_v0, %v904_v50  ;;  %v1008_v19 = vsel %vm1007_vm9, %v1943_v52, %v778_v49  ;;  %v942_v26 = vadd.f32 %v941_v22, %v940_v15  ;;  %v979_v52 = vadd.f32 %v978_v12, %v977_v43 }
 0x51e   : > { %v1029_v24 = vsel %vm1013_vm13, %v1028_v54, %v2018_v8  ;;  %v1010_v25 = vsel %vm1009_vm10, %v1008_v19, %v2020_v11  ;;  %v948_v28 = vrot.slane %v947_v48, 4  ;;  %v955_v33 = vrot.slane %v954_v4, 4 }
 0x51f   : > { %v1030_v31 = vsel %vm1015_vm14, %v1029_v24, %v2010_v32  ;;  %v1012_v0 = vsel %vm1011_vm12, %v1010_v25, %v2012_v58  ;;  %v841_v30 = vadd.f32 %v840_v55, %v839_v61  ;;  %v943_v21 = vrot.slane %v942_v26, 2 }
 0x520   : > { %1079 = vmatmul.f32.vlgmr.msra.gmra.mxu3 %v1030_v31  ;;  %v1014_v18 = vsel %vm1013_vm13, %v1012_v0, %v799_v20  ;;  %v949_v35 = vadd.f32 %v948_v28, %v947_v48  ;;  %v956_v44 = vadd.f32 %v955_v33, %v954_v4  ;;  %v968_v11 = vmul.f32 %v1828_v27, %v2025_v51 }
 0x521   : > { %v1016_v8 = vsel %vm1015_vm14, %v1014_v18, %v806_v45  ;;  %v985_v17 = vrot.slane %v984_v23, 2  ;;  %v944_v32 = vadd.f32 %v943_v21, %v942_v26  ;;  %v1031_v58 = vsel %vm1003_vm7, %v925_v53, %v2022_v3  ;;  %v1096_v21 = vld [vmem:[%s2174_s5] sm:$0xff] }
 0x522   : > { %1073 = vmatmul.f32.vlgmr.msra.gmra.mxu0 %v1016_v8  ;;  %v860_v6 = vadd.f32 %v859_v16, %v858_v39  ;;  %v950_v36 = vrot.slane %v949_v35, 2  ;;  %v957_v7 = vrot.slane %v956_v44, 2  ;;  %v966_v38 = vrot.slane %v2041_v29, 1 }
 0x523   : > { %v969_v5 = vrot.slane %v968_v11, 4  ;;  %v945_v40 = vrot.slane %v944_v32, 1  ;;  %v1032_v43 = vsel %vm1005_vm8, %v1031_v58, %v2000_v57  ;;  %v1020_v27 = vsel %vm1009_vm10, %v2016_v63, %v841_v30  ;;  %v1171_v58 = vld [vmem:[%s2176_s7 + $0x10] sm:$0xff] }
 0x524   : > { %v861_v37 = vrot.slane %v860_v6, 1  ;;  %v951_v45 = vadd.f32 %v950_v36, %v949_v35  ;;  %v958_v41 = vadd.f32 %v957_v7, %v956_v44  ;;  %v1021_v46 = vsel %vm1011_vm12, %v1020_v27, %v848_v34  ;;  %v1097_v44 = vld [vmem:[%s2174_s5 + $0x8] sm:$0xff]  ;;  %v1098_v36 = vld [vmem:[%s2174_s5 + $0x10] sm:$0xff] }
 0x525   : > { %v970_v42 = vadd.f32 %v969_v5, %v968_v11  ;;  %v986_v3 = vadd.f32 %v985_v17, %v984_v23  ;;  %v946_v39 = vadd.f32 %v945_v40, %v944_v32  ;;  %v1022_v61 = vsel %vm1013_vm13, %v1021_v46, %v855_v9  ;;  %v1092_v5 = vld [vmem:[%s2173_s4] sm:$0xff]  ;;  %v1170_v27 = vld [vmem:[%s2176_s7 + $0x8] sm:$0xff] }
 0x526   : > { %v862_v47 = vadd.f32 %v861_v37, %v860_v6  ;;  %v952_v56 = vrot.slane %v951_v45, 1  ;;  %v959_v59 = vrot.slane %v958_v41, 1  ;;  %v989_v57 = vmul.f32 %v1880_v62, %v2025_v51  ;;  %v1169_v6 = vld [vmem:[%s2176_s7] sm:$0xff]  ;;  %v1093_v37 = vld [vmem:[%s2173_s4 + $0x8] sm:$0xff] }
 0x527   : > { %v971_v1 = vrot.slane %v970_v42, 2  ;;  %v1033_v2 = vsel %vm1007_vm9, %v1032_v43, %v946_v39  ;;  %v996_v63 = vmul.f32 %v1876_v60, %v2025_v51  ;;  %v980_v14 = vrot.slane %v979_v52, 1  ;;  %v1236_v40 = vld [vmem:[%s2178_s9] sm:$0x1f]  ;;  %v1172_v43 = vld [vmem:[%s2176_s7 + $0x18] sm:$0xff] }
 0x528   : > { %v953_v10 = vadd.f32 %v952_v56, %v951_v45  ;;  %v1023_v34 = vsel %vm1015_vm14, %v1022_v61, %v862_v47  ;;  %v990_v13 = vrot.slane %v989_v57, 4  ;;  %v987_v15 = vrot.slane %v986_v3, 1  ;;  %v1094_v45 = vld [vmem:[%s2173_s4 + $0x10] sm:$0xff] }
 0x529   : > { %v972_v12 = vadd.f32 %v971_v1, %v970_v42  ;;  %v960_v49 = vadd.f32 %v959_v59, %v958_v41  ;;  %v997_v9 = vrot.slane %v996_v63, 4  ;;  %v967_v16 = vadd.f32 %v966_v38, %v2041_v29  ;;  %v1095_v41 = vld [vmem:[%s2173_s4 + $0x18] sm:$0xff] }
 0x52a   : > { %1076 = vmatmul.f32.gmra.mxu0 %v1023_v34  ;;  %v1034_v62 = vsel %vm1009_vm10, %v1033_v2, %v953_v10  ;;  %v991_v55 = vadd.f32 %v990_v13, %v989_v57  ;;  %v981_v53 = vadd.f32 %v980_v14, %v979_v52  ;;  %v988_v54 = vadd.f32 %v987_v15, %v986_v3  ;;  %v1099_v52 = vld [vmem:[%s2174_s5 + $0x18] sm:$0xff]  ;;  %v1165_v10 = vld [vmem:[%s2175_s6] sm:$0xff]  ;;  %v1167_v34 = vld [vmem:[%s2175_s6 + $0x10] sm:$0xff] }
 0x52b   : > { %v973_v50 = vrot.slane %v972_v12, 1  ;;  %v1035_v20 = vsel %vm1011_vm12, %v1034_v62, %v960_v49  ;;  %v998_v22 = vadd.f32 %v997_v9, %v996_v63  ;;  %v1548_v30 = vmov 0   ;;  %v1168_v13 = vld [vmem:[%s2175_s6 + $0x18] sm:$0xff] }
 0x52c   : > { %v1036_v51 = vsel %vm1013_vm13, %v1035_v20, %v967_v16  ;;  %v992_v48 = vrot.slane %v991_v55, 2  ;;  %v1038_v26 = vsel %vm1003_vm7, %v981_v53, %v988_v54  ;;  %1478 = vset.pattern.permute.xlu1 %v1548_v30  ;;  %1480 = vset.pattern.permute.xlu0 %v1548_v30  ;;  %vm1265_vm2 = vcmask 126976  }
 0x52d   : > { %v974_v60 = vadd.f32 %v973_v50, %v972_v12  ;;  %v999_v19 = vrot.slane %v998_v22, 2  ;;  %1117 = vperm.xlu1 %1478, %v1099_v52   ;;  %1479 = vset.pattern.permute.xlu2 %v1548_v30  ;;  %v1166_v12 = vld [vmem:[%s2175_s6 + $0x8] sm:$0xff] }
 0x52e   : > { %v993_v23 = vadd.f32 %v992_v48, %v991_v55  ;;  %1107 = vperm.xlu0 %1480, %v1097_v44   ;;  %1112 = vperm.xlu2 %1479, %v1098_v36   ;;  %v1235_v48 = vld [vmem:[%s2177_s8] sm:$0x1f] }
 0x52f   : > { %v1037_v4 = vsel %vm1015_vm14, %v1036_v51, %v974_v60  ;;  %v1000_v24 = vadd.f32 %v999_v19, %v998_v22 }
 0x530   : > { %1082 = vmatmul.f32.gmra.mxu3 %v1037_v4  ;;  %v994_v29 = vrot.slane %v993_v23, 1 }
 0x531   : > { %v1001_v25 = vrot.slane %v1000_v24, 1 }
 0x532   : > { %v995_v31 = vadd.f32 %v994_v29, %v993_v23 }
 0x533   : > { %v1002_v0 = vadd.f32 %v1001_v25, %v1000_v24 }
 0x534   : > { %v1039_v28 = vsel %vm1005_vm8, %v1038_v26, %v995_v31 }
 0x535   : > { %v1040_v33 = vsel %vm1007_vm9, %v1039_v28, %v1002_v0  ;;  %1102 = vperm.xlu1 %1478, %v1096_v21  }
 0x536   : > { %1175 = vperm.xlu0 %1480, %v1169_v6   ;;  %1190 = vperm.xlu2 %1479, %v1172_v43  }
 0x538   : > { %1085 = vmatmul.f32.gmra.mxu3 %v1040_v33 }
 0x53d   : > { %1185 = vperm.xlu1 %1478, %v1171_v58  }
 0x53e   : > { %1180 = vperm.xlu2 %1479, %v1170_v27  }
 0x545   : > { %1239 = vperm.xlu1 %1478, %v1236_v40  }
 0x588   : > { %v1113_v59 = vpop.permute.xlu2 %1112 }
 0x590   : > { %v1191_v9 = vpop.permute.xlu2 %1190 }
 0x598   : > { %v1181_v20 = vpop.permute.xlu2 %1180 }
 0x59f   : > { %v1074_v8 = vpop.f32.mrf.mxu0  ;;  %v1118_v39 = vpop.permute.xlu1 %1117 }
 0x5a0   : > { %v1089_v38 = vsub.f32 1.0, %v1074_v8  ;;  %v1108_v56 = vpop.permute.xlu0 %1107 }
 0x5a3   : > { %v1080_v18 = vpop.f32.mrf.mxu3 }
 0x5a7   : > { %v1077_v11 = vpop.f32.mrf.mxu0  ;;  %v1103_v57 = vpop.permute.xlu1 %1102 }
 0x5a8   : > { %v1090_v32 = vsub.f32 1.0, %v1077_v11  ;;  %v1176_v60 = vpop.permute.xlu0 %1175 }
 0x5aa   : > { %v1091_v7 = vsel %vm1003_vm7, %v1090_v32, %v1077_v11 }
 0x5af   : > { %v1186_v62 = vpop.permute.xlu1 %1185 }
 0x5b3   : > { %v1083_v35 = vpop.f32.mrf.mxu3 }
 0x5b4   : > { %1268 = vst.msk [vmem:[%s467_s23 - $0x7] sm:$0x80] %vm1267_vm15, %v1083_v35 }
 0x5b7   : > { %v1240_v53 = vpop.permute.xlu1 %1239 }
 0x5bb   : > { %v1086_v17 = vpop.f32.mrf.mxu3 }
 0x5bc   : > { %1401 = vmatpush.msk.msra.mxu1 %vm1009_vm10, %v1086_v17 }
 0x5be   : > { %1148 = vmatpush.msra.mxu1 %v1083_v35 }
 0x5c0   : > { %1149 = vmatpush.msra.mxu1 %v1080_v18 }
 0x5c2   : > { %1150 = vmatpush.msra.mxu1 %v1091_v7 }
 0x5c4   : > { %1151 = vmatpush.msra.mxu1 %v1089_v38 }
 0x5c5   : > { %1402 = vmatmul.msk.f32.vlgmr.msra.gmra.mxu1 %vm1120_vm0, %v1092_v5 }
 0x5cd   : > { %1403 = vmatmul.msk.f32.gmra.mxu1 %vm1120_vm0, %v1093_v37 }
 0x5d5   : > { %1404 = vmatmul.msk.f32.gmra.mxu1 %vm1120_vm0, %v1094_v45 }
 0x5dd   : > { %1405 = vmatmul.msk.f32.gmra.mxu1 %vm1120_vm0, %v1095_v41 }
 0x642   : > { %v1153_v42 = vpop.f32.mrf.mxu1 }
 0x643   : > { %v1154_v63 = vadd.f32 %v1153_v42, %v1103_v57 }
 0x64a   : > { %v1156_v46 = vpop.f32.mrf.mxu1 }
 0x64b   : > { %v1157_v2 = vadd.f32 %v1156_v46, %v1108_v56 }
 0x652   : > { %v1159_v3 = vpop.f32.mrf.mxu1 }
 0x653   : > { %v1160_v1 = vadd.f32 %v1159_v3, %v1113_v59 }
 0x65a   : > { %v1162_v47 = vpop.f32.mrf.mxu1 }
 0x65b   : > { %v1163_v61 = vadd.f32 %v1162_v47, %v1118_v39 }
 0x65d   : > { %1218 = vmatpush.msra.mxu2 %v1163_v61 }
 0x65f   : > { %1219 = vmatpush.msra.mxu2 %v1160_v1 }
 0x661   : > { %1220 = vmatpush.msra.mxu2 %v1157_v2 }
 0x663   : > { %1221 = vmatpush.msra.mxu2 %v1154_v63 }
 0x664   : > { %1406 = vmatmul.msk.f32.vlgmr.msra.gmra.mxu2 %vm1193_vm1, %v1165_v10 }
 0x66c   : > { %1407 = vmatmul.msk.f32.gmra.mxu2 %vm1193_vm1, %v1166_v12 }
 0x674   : > { %1408 = vmatmul.msk.f32.gmra.mxu2 %vm1193_vm1, %v1167_v34 }
 0x67c   : > { %1409 = vmatmul.msk.f32.gmra.mxu2 %vm1193_vm1, %v1168_v13 }
 0x6e7   : > { %v1223_v14 = vpop.f32.mrf.mxu2 }
 0x6e8   : > { %v1224_v51 = vadd.f32 %v1223_v14, %v1176_v60 }
 0x6ef   : > { %v1226_v15 = vpop.f32.mrf.mxu2 }
 0x6f0   : > { %v1227_v22 = vadd.f32 %v1226_v15, %v1181_v20 }
 0x6f7   : > { %v1229_v49 = vpop.f32.mrf.mxu2 }
 0x6f8   : > { %v1230_v55 = vadd.f32 %v1229_v49, %v1186_v62 }
 0x6ff   : > { %v1232_v16 = vpop.f32.mrf.mxu2 }
 0x700   : > { %v1233_v50 = vadd.f32 %v1232_v16, %v1191_v9 }
 0x702   : > { %1257 = vmatpush.msrb.mxu2 %v1233_v50 }
 0x704   : > { %1258 = vmatpush.msrb.mxu2 %v1230_v55 }
 0x706   : > { %1259 = vmatpush.msrb.mxu2 %v1227_v22 }
 0x708   : > { %1260 = vmatpush.msrb.mxu2 %v1224_v51 }
 0x709   : > { %1410 = vmatmul.msk.f32.vlgmr.msrb.gmra.mxu2 %vm1193_vm1, %v1235_v48 }
 0x78c   : > { %v1262_v54 = vpop.f32.mrf.mxu2 }
 0x78d   : > { %v1263_v19 = vadd.f32 %v1262_v54, %v1240_v53 }
 0x78f   : > { %1266 = vst.msk [vmem:[%s464_s25] sm:$0x1f] %vm1265_vm2, %v1263_v19 }
 0x790 PF: > { %p21_p12 = scmp.ge.s32.totalorder %s1628_s21, 4   ;;  %s2187_s17 = smov %s1537_s18 }
 0x791   : > { %s2188_s18 = smov %s1638_s24  ;;  %s2189_s19 = smov %s1628_s21 }
 0x792   :  { %23 = sbr.rel (!%p21_p12) target bundleno = 3 (0x3), region = 157 }
 0x797   :  { %1300 = vsyncpa [#allocation4], 1 }
 0x798   :  { %1302 = vsyncpa [#allocation4 + $0x1], 1 }
 0x799   :  { %1303 = vsyncpa [#allocation6], 1 }

</bundles_post_ra>
